<compile_context>
chip_gen: v7x
topology: tpu7x:2x2x1
jax: 0.10.0
libtpu: 0.0.40
codegen_flags: <defaults>
</compile_context>

<pallas_src>
import math
import numpy as np
import jax
import jax.numpy as jnp
from jax.experimental import pallas as pl
from jax.experimental.pallas import tpu as pltpu

# ----- model config (scaled-down ViT-base) -----
B = 2            # batch
C = 3            # channels
IMG = 16         # image size
P = 8            # patch size
NP = (IMG // P) ** 2      # patches per image = 4
S = NP + 1                # sequence length incl. CLS = 5
D = 32                    # hidden size
NH = 4                    # attention heads
DH = D // NH              # head dim = 8
FF = 64                   # MLP intermediate size
L = 2                     # encoder layers
EPS = 1e-12               # ViT layer_norm_eps
NEG_INF = -1e30

# ----- packing / layout constants -----
BS = B * S                # flattened tokens = 10
PAD = 16                  # sublane padding of the BS rows per head (multiple of 8 >= BS)
NHP = NH * PAD            # stacked attention rows = 64
PADL = 128                # lane stride so q/k/v start on 128-lane vreg boundaries

# lhs slab (per layer): rows 0:D = [wqkv_padded | w1], row D = their biases
LHS_ROWS = 40
LHS_LANES = 3 * PADL + FF                 # 448
# rhs slab (per layer): wo rows 0:D, w2 rows D:D+FF, bo row 96, b2 row 104
RHS_ROWS = 112
R_BO = D + FF                             # 96
R_B2 = 104

# constants slab: attention structural constants + embedding + classifier (all 8-row aligned)
CONST_LANES = 64
RO_REP = 0                                # (NHP, BS) token->stacked-head replication matrix
RO_BMASK = RO_REP + NHP                   # 64  (NHP, BS) additive block-diagonal batch mask
RO_HM = RO_BMASK + NHP                    # 128 (NHP, D)  per-head feature-column mask
RO_COMB = RO_HM + NHP                     # 192 (BS, NHP) head recombination matrix
RO_CSEL = RO_COMB + PAD                   # 208 (B, BS)   CLS-row selection matrix
RO_PW = RO_CSEL + 8                       # 216 (C*P*P,D) patch-embedding weight
RO_PB = RO_PW + C * P * P                 # 408 (BS, D)   fused cls/conv-bias/pos-emb token bias
RO_CW = 424                               # (1, D)        classifier weight (final LN folded)
RO_CB = 432                               # (1, 1)        classifier bias  (final LN folded)
CONST_ROWS = 440


# ---------------- fused Pallas kernel ----------------

def _vit_kernel(x_ref, lhs_ref, rhs_ref, c_ref, o_ref):
    f32 = jnp.float32

    def rownorm(x):
        # LayerNorm without affine (gamma/beta are folded into the following matmul at pack time).
        mu = jnp.mean(x, axis=-1, keepdims=True)
        xc = x - mu
        var = jnp.mean(xc * xc, axis=-1, keepdims=True)
        return xc * jax.lax.rsqrt(var + EPS)

    rep = c_ref[RO_REP:RO_REP + NHP, 0:BS]             # (64, 10)
    bmask = c_ref[RO_BMASK:RO_BMASK + NHP, 0:BS]       # (64, 10)
    hm = c_ref[RO_HM:RO_HM + NHP, 0:D]                 # (64, 32)
    comb = c_ref[RO_COMB:RO_COMB + BS, 0:NHP]          # (10, 64)
    csel = c_ref[RO_CSEL:RO_CSEL + B, 0:BS]            # (2, 10)
    pw = c_ref[RO_PW:RO_PW + C * P * P, 0:D]           # (192, 32)
    pb = c_ref[RO_PB:RO_PB + BS, 0:D]                  # (10, 32)
    cw = c_ref[RO_CW:RO_CW + 1, 0:D]                   # (1, 32)
    cb = c_ref[RO_CB:RO_CB + 1, 0:1]                   # (1, 1)

    # Patch embedding: CLS rows of x are zero; cls_token + conv bias + pos_emb pre-fused in pb.
    h = jnp.dot(x_ref[...], pw, preferred_element_type=f32) + pb     # (10, 32)
    # TODO(synk): dropout layers are identity in eval mode and are omitted.

    for layer in range(L):        # static unroll; all weights stay resident in VMEM
        lhs = lhs_ref[layer]      # (40, 448)
        rhs = rhs_ref[layer]      # (112, 32)
        wqkv = lhs[0:D, 0:3 * PADL]                     # (32, 384): q@0, k@128, v@256 lanes
        bqkv = lhs[D:D + 1, 0:3 * PADL]                 # (1, 384)
        w1 = lhs[0:D, 3 * PADL:LHS_LANES]               # (32, 64)
        b1 = lhs[D:D + 1, 3 * PADL:LHS_LANES]           # (1, 64)
        wo = rhs[0:D, :]                                # (32, 32)
        w2 = rhs[D:D + FF, :]                           # (64, 32)
        bo = rhs[R_BO:R_BO + 1, :]                      # (1, 32)
        b2 = rhs[R_B2:R_B2 + 1, :]                      # (1, 32)

        # ---- self-attention (pre-LN affine folded into wqkv/bqkv), residual fused ----
        hn = rownorm(h)
        qkv = jnp.dot(hn, wqkv, preferred_element_type=f32) + bqkv   # (10, 384)
        q = qkv[:, 0:D]                     # 1/sqrt(DH) already folded into wq/bq
        k = qkv[:, PADL:PADL + D]           # 128-lane-aligned slices: no lane relayout
        v = qkv[:, 2 * PADL:2 * PADL + D]

        # All NH heads at once: sublane-stacked masked queries -> 1 score matmul,
        # 1 softmax, 1 P@V matmul, 1 recombination matmul.
        qs = jnp.dot(rep, q, preferred_element_type=f32) * hm        # (64, 32)
        s = jax.lax.dot_general(qs, k, (((1,), (1,)), ((), ())),
                                preferred_element_type=f32) + bmask  # (64, 10)
        p = jnp.exp(s)                       # no max-subtraction (see header); masked -> 0
        denom = jnp.sum(p, axis=-1, keepdims=True)                   # (64, 1)
        ctx = jnp.dot(p, v, preferred_element_type=f32)              # (64, 32)
        ctx = ctx * pl.reciprocal(denom, approx=True)                # deferred softmax normalize
        ctx = jnp.dot(comb, ctx * hm, preferred_element_type=f32)    # (10, 32) heads recombined
        h = h + jnp.dot(ctx, wo, preferred_element_type=f32) + bo

        # ---- MLP (pre-LN affine folded into w1/b1), residual fused ----
        hn = rownorm(h)
        ff = jnp.dot(hn, w1, preferred_element_type=f32) + b1        # (10, 64)
        ff = 0.5 * ff * (1.0 + jax.lax.erf(ff * (1.0 / math.sqrt(2.0))))   # exact GELU
        h = h + jnp.dot(ff, w2, preferred_element_type=f32) + b2

    # CLS rows first (row-select commutes with row-wise LN), then LN; affine folded into cw/cb.
    cls = jnp.dot(csel, h, preferred_element_type=f32)               # (2, 32)
    cls = rownorm(cls)
    logits = jnp.sum(cls * cw, axis=-1, keepdims=True) + cb          # (2, 1)
    o_ref[...] = jax.nn.sigmoid(logits).astype(o_ref.dtype)


# ---------------- parameters ----------------

def init_params(key):
    keys = iter(jax.random.split(key, 80))

    def nrm(shape, scale=0.02):
        return scale * jax.random.normal(next(keys), shape, dtype=jnp.float32)

    params = {
        # Conv2d(C, D, kernel=P, stride=P) weight stored as (C*P*P, D).
        # (For real PyTorch weights (D,C,P,P): reshape to (D, C*P*P) then transpose.)
        "patch_w": nrm((C * P * P, D)),
        "patch_b": jnp.zeros((1, D), jnp.float32),
        "cls_token": nrm((1, 1, D)),
        "pos_emb": nrm((1, S, D)),
        "ln_f_g": jnp.ones((1, D), jnp.float32),
        "ln_f_b": jnp.zeros((1, D), jnp.float32),
        "clf_w": nrm((D, 1)),
        "clf_b": jnp.zeros((1, 1), jnp.float32),
        "layers": [],
    }
    for _ in range(L):
        params["layers"].append(dict(
            ln1_g=jnp.ones((1, D), jnp.float32), ln1_b=jnp.zeros((1, D), jnp.float32),
            wq=nrm((D, D)), bq=jnp.zeros((1, D), jnp.float32),
            wk=nrm((D, D)), bk=jnp.zeros((1, D), jnp.float32),
            wv=nrm((D, D)), bv=jnp.zeros((1, D), jnp.float32),
            wo=nrm((D, D)), bo=jnp.zeros((1, D), jnp.float32),
            ln2_g=jnp.ones((1, D), jnp.float32), ln2_b=jnp.zeros((1, D), jnp.float32),
            w1=nrm((D, FF)), b1=jnp.zeros((1, FF), jnp.float32),
            w2=nrm((FF, D)), b2=jnp.zeros((1, D), jnp.float32),
        ))
    return params


def pack_params(params):
    """One-time host-side packing: fold LN affines + 1/sqrt(DH) into adjacent matmuls, pad the
    fused QKV weight to 128-lane q/k/v boundaries, pre-fuse cls/pos/conv-bias into one token
    bias, build attention structural constants, and pack everything into 3 aligned slabs."""
    f32 = np.float32
    scale = 1.0 / math.sqrt(DH)

    def fold_ln(g, b, w, bias):
        # (norm(x)*g + b) @ w + bias  ==  norm(x) @ (g[:,None]*w) + (b@w + bias)
        g = np.asarray(g, f32).reshape(D, 1)
        b = np.asarray(b, f32).reshape(1, D)
        w = np.asarray(w, f32)
        bias = np.asarray(bias, f32)
        return g * w, (b @ w + bias).reshape(-1)

    lhs = np.zeros((L, LHS_ROWS, LHS_LANES), f32)
    rhs = np.zeros((L, RHS_ROWS, D), f32)
    for li, lp in enumerate(params["layers"]):
        wq, bq = fold_ln(lp["ln1_g"], lp["ln1_b"],
                         np.asarray(lp["wq"], f32) * scale, np.asarray(lp["bq"], f32) * scale)
        wk, bk = fold_ln(lp["ln1_g"], lp["ln1_b"], lp["wk"], lp["bk"])
        wv, bv = fold_ln(lp["ln1_g"], lp["ln1_b"], lp["wv"], lp["bv"])
        w1, b1 = fold_ln(lp["ln2_g"], lp["ln2_b"], lp["w1"], lp["b1"])
        lhs[li, 0:D, 0:D] = wq
        lhs[li, 0:D, PADL:PADL + D] = wk
        lhs[li, 0:D, 2 * PADL:2 * PADL + D] = wv
        lhs[li, 0:D, 3 * PADL:] = w1
        lhs[li, D, 0:D] = bq
        lhs[li, D, PADL:PADL + D] = bk
        lhs[li, D, 2 * PADL:2 * PADL + D] = bv
        lhs[li, D, 3 * PADL:] = b1
        rhs[li, 0:D, :] = np.asarray(lp["wo"], f32)
        rhs[li, D:D + FF, :] = np.asarray(lp["w2"], f32)
        rhs[li, R_BO, :] = np.asarray(lp["bo"], f32).reshape(D)
        rhs[li, R_B2, :] = np.asarray(lp["b2"], f32).reshape(D)

    consts = np.zeros((CONST_ROWS, CONST_LANES), f32)
    # Attention structural constants.
    for hh in range(NH):
        consts[RO_HM + hh * PAD:RO_HM + (hh + 1) * PAD, hh * DH:(hh + 1) * DH] = 1.0
        for r in range(BS):
            consts[RO_REP + hh * PAD + r, r] = 1.0          # replicate token r into head hh block
            consts[RO_COMB + r, hh * PAD + r] = 1.0         # sum head blocks back per token
            for j in range(BS):
                if (r // S) != (j // S):                    # cross-sequence attention forbidden
                    consts[RO_BMASK + hh * PAD + r, j] = NEG_INF
        # padding rows (r >= BS) keep bmask == 0 so their softmax denom stays finite
    for b in range(B):
        consts[RO_CSEL + b, b * S] = 1.0                    # CLS row of sequence b
    # Patch-embedding weight and fused per-token bias (cls_token / conv bias / pos_emb).
    consts[RO_PW:RO_PW + C * P * P, 0:D] = np.asarray(params["patch_w"], f32)
    emb_bias = np.zeros((B, S, D), f32)
    emb_bias[:, 0, :] = np.asarray(params["cls_token"], f32).reshape(D)
    emb_bias[:, 1:, :] = np.asarray(params["patch_b"], f32).reshape(1, 1, D)
    emb_bias += np.asarray(params["pos_emb"], f32)
    consts[RO_PB:RO_PB + BS, 0:D] = emb_bias.reshape(BS, D)
    # Classifier with the final-LN affine folded through the CLS selection.
    cwf = np.asarray(params["ln_f_g"], f32).reshape(D, 1) * np.asarray(params["clf_w"], f32)
    cbf = np.asarray(params["ln_f_b"], f32) @ np.asarray(params["clf_w"], f32) \
        + np.asarray(params["clf_b"], f32)
    consts[RO_CW, 0:D] = cwf.reshape(D)
    consts[RO_CB, 0] = cbf[0, 0]

    return dict(lhs=jnp.asarray(lhs), rhs=jnp.asarray(rhs), consts=jnp.asarray(consts))


# ---------------- forward pass (one pallas_call) ----------------

@jax.jit
def vit_binary_classifier(pixel_values, packed):
    # Patchify (pure layout glue): Conv2d(k=P, stride=P) == unfold + matmul.  A zero row is
    # inserted per sequence where the CLS token goes so one in-kernel matmul covers all rows.
    x = pixel_values.reshape(B, C, IMG // P, P, IMG // P, P)
    x = x.transpose(0, 2, 4, 1, 3, 5).reshape(B, NP, C * P * P)
    x = jnp.concatenate([jnp.zeros((B, 1, C * P * P), x.dtype), x], axis=1)
    x = x.reshape(BS, C * P * P)

    vmem = pl.BlockSpec(memory_space=pltpu.MemorySpace.VMEM)
    return pl.pallas_call(
        _vit_kernel,
        out_shape=jax.ShapeDtypeStruct((B, 1), jnp.float32),
        in_specs=[vmem, vmem, vmem, vmem],
        out_specs=vmem,
    )(x, packed["lhs"], packed["rhs"], packed["consts"])


# ---------------- pure-JAX reference (validates the foldings / fusions) ----------------

def vit_reference(pixel_values, params):
    x = pixel_values.reshape(B, C, IMG // P, P, IMG // P, P)
    x = x.transpose(0, 2, 4, 1, 3, 5).reshape(B, NP, C * P * P)
    emb = x @ params["patch_w"] + params["patch_b"]
    cls = jnp.broadcast_to(params["cls_token"], (B, 1, D))
    h = jnp.concatenate([cls, emb], axis=1) + params["pos_emb"]

    def ln(x, g, b):
        mu = x.mean(-1, keepdims=True)
        var = ((x - mu) ** 2).mean(-1, keepdims=True)
        return (x - mu) * jax.lax.rsqrt(var + EPS) * g + b

    for lp in params["layers"]:
        hn = ln(h, lp["ln1_g"], lp["ln1_b"])
        q = (hn @ lp["wq"] + lp["bq"]).reshape(B, S, NH, DH).transpose(0, 2, 1, 3)
        k = (hn @ lp["wk"] + lp["bk"]).reshape(B, S, NH, DH).transpose(0, 2, 1, 3)
        v = (hn @ lp["wv"] + lp["bv"]).reshape(B, S, NH, DH).transpose(0, 2, 1, 3)
        s = jnp.einsum("bhqd,bhkd->bhqk", q, k) / math.sqrt(DH)
        p = jax.nn.softmax(s, axis=-1)
        ctx = jnp.einsum("bhqk,bhkd->bhqd", p, v).transpose(0, 2, 1, 3).reshape(B, S, D)
        h = h + ctx @ lp["wo"] + lp["bo"]
        hn = ln(h, lp["ln2_g"], lp["ln2_b"])
        ff = hn @ lp["w1"] + lp["b1"]
        ff = 0.5 * ff * (1.0 + jax.lax.erf(ff / math.sqrt(2.0)))
        h = h + ff @ lp["w2"] + lp["b2"]
    h = ln(h, params["ln_f_g"], params["ln_f_b"])
    return jax.nn.sigmoid(h[:, 0, :] @ params["clf_w"] + params["clf_b"])


if __name__ == "__main__":
    key = jax.random.PRNGKey(0)
    k_in, k_par = jax.random.split(key)
    pixel_values = jax.random.normal(k_in, (B, C, IMG, IMG), dtype=jnp.float32)
    params = init_params(k_par)
    packed = pack_params(params)

    out = vit_binary_classifier(pixel_values, packed)
    out = jax.block_until_ready(out)
    assert out.shape == (B, 1)
    assert bool(jnp.all((out >= 0.0) & (out <= 1.0)))

    # Cross-check against a pure-JAX reference of the same forward pass (tolerance covers MXU
    # vs XLA f32 matmul precision and the approx-reciprocal softmax normalization).
    ref = vit_reference(pixel_values, params)
    assert bool(jnp.allclose(out, ref, atol=5e-3, rtol=0.0)), (out, ref)
    print("KERNEL_OK")
</pallas_src>

<mosaic_0001>
module attributes {stable_mosaic.version = 11 : i64} {
  func.func @_vit_kernel(%arg0: memref<10x192xf32, #tpu.memory_space<vmem>>, %arg1: memref<2x40x448xf32, #tpu.memory_space<vmem>>, %arg2: memref<2x112x32xf32, #tpu.memory_space<vmem>>, %arg3: memref<440x64xf32, #tpu.memory_space<vmem>>, %arg4: memref<2x1xf32, #tpu.memory_space<vmem>>) attributes {dimension_semantics = [], scalar_prefetch = 0 : i64, scratch_operands = 0 : i64, tpu.core_type = #tpu.core_type<tc>} {
    %c0 = arith.constant 0 : index
    %c0_0 = arith.constant 0 : index
    %0 = vector.load %arg3[%c0, %c0_0] : memref<440x64xf32, #tpu.memory_space<vmem>>, vector<64x10xf32>
    %c64 = arith.constant 64 : index
    %c0_1 = arith.constant 0 : index
    %1 = vector.load %arg3[%c64, %c0_1] : memref<440x64xf32, #tpu.memory_space<vmem>>, vector<64x10xf32>
    %c128 = arith.constant 128 : index
    %c0_2 = arith.constant 0 : index
    %2 = vector.load %arg3[%c128, %c0_2] : memref<440x64xf32, #tpu.memory_space<vmem>>, vector<64x32xf32>
    %c192 = arith.constant 192 : index
    %c0_3 = arith.constant 0 : index
    %3 = vector.load %arg3[%c192, %c0_3] : memref<440x64xf32, #tpu.memory_space<vmem>>, vector<10x64xf32>
    %c208 = arith.constant 208 : index
    %c0_4 = arith.constant 0 : index
    %4 = vector.load %arg3[%c208, %c0_4] : memref<440x64xf32, #tpu.memory_space<vmem>>, vector<2x10xf32>
    %c216 = arith.constant 216 : index
    %c0_5 = arith.constant 0 : index
    %5 = vector.load %arg3[%c216, %c0_5] : memref<440x64xf32, #tpu.memory_space<vmem>>, vector<192x32xf32>
    %c408 = arith.constant 408 : index
    %c0_6 = arith.constant 0 : index
    %6 = vector.load %arg3[%c408, %c0_6] : memref<440x64xf32, #tpu.memory_space<vmem>>, vector<10x32xf32>
    %c424 = arith.constant 424 : index
    %c0_7 = arith.constant 0 : index
    %7 = vector.load %arg3[%c424, %c0_7] : memref<440x64xf32, #tpu.memory_space<vmem>>, vector<1x32xf32>
    %c432 = arith.constant 432 : index
    %c0_8 = arith.constant 0 : index
    %8 = vector.load %arg3[%c432, %c0_8] : memref<440x64xf32, #tpu.memory_space<vmem>>, vector<1x1xf32>
    %c0_9 = arith.constant 0 : index
    %c0_10 = arith.constant 0 : index
    %9 = vector.load %arg0[%c0_9, %c0_10] : memref<10x192xf32, #tpu.memory_space<vmem>>, vector<10x192xf32>
    %cst = arith.constant dense<0.000000e+00> : vector<10x32xf32>
    %10 = tpu.matmul %9, %5, %cst {dimension_numbers = #tpu.dot_dimension_numbers<[1], [0], [0], [1], [0, 0, 1, 1], [], []>} : vector<10x192xf32>, vector<192x32xf32>, vector<10x32xf32> -> vector<10x32xf32>
    %11 = arith.addf %10, %6 : vector<10x32xf32>
    %c0_11 = arith.constant 0 : index
    %c0_12 = arith.constant 0 : index
    %c0_13 = arith.constant 0 : index
    %12 = vector.load %arg1[%c0_11, %c0_12, %c0_13] : memref<2x40x448xf32, #tpu.memory_space<vmem>>, vector<1x40x448xf32>
    %13 = vector.shape_cast %12 : vector<1x40x448xf32> to vector<40x448xf32>
    %c0_14 = arith.constant 0 : index
    %c0_15 = arith.constant 0 : index
    %c0_16 = arith.constant 0 : index
    %14 = vector.load %arg2[%c0_14, %c0_15, %c0_16] : memref<2x112x32xf32, #tpu.memory_space<vmem>>, vector<1x112x32xf32>
    %15 = vector.shape_cast %14 : vector<1x112x32xf32> to vector<112x32xf32>
    %16 = vector.extract_strided_slice %13 {offsets = [0, 0], sizes = [32, 384], strides = [1, 1]} : vector<40x448xf32> to vector<32x384xf32>
    %17 = vector.extract_strided_slice %13 {offsets = [32, 0], sizes = [1, 384], strides = [1, 1]} : vector<40x448xf32> to vector<1x384xf32>
    %18 = vector.extract_strided_slice %13 {offsets = [0, 384], sizes = [32, 64], strides = [1, 1]} : vector<40x448xf32> to vector<32x64xf32>
    %19 = vector.extract_strided_slice %13 {offsets = [32, 384], sizes = [1, 64], strides = [1, 1]} : vector<40x448xf32> to vector<1x64xf32>
    %20 = vector.extract_strided_slice %15 {offsets = [0, 0], sizes = [32, 32], strides = [1, 1]} : vector<112x32xf32> to vector<32x32xf32>
    %21 = vector.extract_strided_slice %15 {offsets = [32, 0], sizes = [64, 32], strides = [1, 1]} : vector<112x32xf32> to vector<64x32xf32>
    %22 = vector.extract_strided_slice %15 {offsets = [96, 0], sizes = [1, 32], strides = [1, 1]} : vector<112x32xf32> to vector<1x32xf32>
    %23 = vector.extract_strided_slice %15 {offsets = [104, 0], sizes = [1, 32], strides = [1, 1]} : vector<112x32xf32> to vector<1x32xf32>
    %cst_17 = arith.constant dense<0.000000e+00> : vector<10xf32>
    %24 = vector.multi_reduction <add>, %11, %cst_17 [1] : vector<10x32xf32> to vector<10xf32>
    %25 = vector.shape_cast %24 : vector<10xf32> to vector<10x1xf32>
    %cst_18 = arith.constant 3.200000e+01 : f32
    %26 = vector.broadcast %cst_18 : f32 to vector<10x1xf32>
    %27 = arith.divf %25, %26 : vector<10x1xf32>
    %28 = vector.broadcast %27 : vector<10x1xf32> to vector<10x32xf32>
    %29 = arith.subf %11, %28 : vector<10x32xf32>
    %30 = arith.mulf %29, %29 : vector<10x32xf32>
    %cst_19 = arith.constant dense<0.000000e+00> : vector<10xf32>
    %31 = vector.multi_reduction <add>, %30, %cst_19 [1] : vector<10x32xf32> to vector<10xf32>
    %32 = vector.shape_cast %31 : vector<10xf32> to vector<10x1xf32>
    %cst_20 = arith.constant 3.200000e+01 : f32
    %33 = vector.broadcast %cst_20 : f32 to vector<10x1xf32>
    %34 = arith.divf %32, %33 : vector<10x1xf32>
    %cst_21 = arith.constant 9.99999996E-13 : f32
    %35 = vector.broadcast %cst_21 : f32 to vector<10x1xf32>
    %36 = arith.addf %34, %35 : vector<10x1xf32>
    %37 = math.rsqrt %36 : vector<10x1xf32>
    %38 = vector.broadcast %37 : vector<10x1xf32> to vector<10x32xf32>
    %39 = arith.mulf %29, %38 : vector<10x32xf32>
    %cst_22 = arith.constant dense<0.000000e+00> : vector<10x384xf32>
    %40 = tpu.matmul %39, %16, %cst_22 {dimension_numbers = #tpu.dot_dimension_numbers<[1], [0], [0], [1], [0, 0, 1, 1], [], []>} : vector<10x32xf32>, vector<32x384xf32>, vector<10x384xf32> -> vector<10x384xf32>
    %41 = vector.broadcast %17 : vector<1x384xf32> to vector<10x384xf32>
    %42 = arith.addf %40, %41 : vector<10x384xf32>
    %43 = vector.extract_strided_slice %42 {offsets = [0, 0], sizes = [10, 32], strides = [1, 1]} : vector<10x384xf32> to vector<10x32xf32>
    %44 = vector.extract_strided_slice %42 {offsets = [0, 128], sizes = [10, 32], strides = [1, 1]} : vector<10x384xf32> to vector<10x32xf32>
    %45 = vector.extract_strided_slice %42 {offsets = [0, 256], sizes = [10, 32], strides = [1, 1]} : vector<10x384xf32> to vector<10x32xf32>
    %cst_23 = arith.constant dense<0.000000e+00> : vector<64x32xf32>
    %46 = tpu.matmul %0, %43, %cst_23 {dimension_numbers = #tpu.dot_dimension_numbers<[1], [0], [0], [1], [0, 0, 1, 1], [], []>} : vector<64x10xf32>, vector<10x32xf32>, vector<64x32xf32> -> vector<64x32xf32>
    %47 = arith.mulf %46, %2 : vector<64x32xf32>
    %cst_24 = arith.constant dense<0.000000e+00> : vector<64x10xf32>
    %48 = tpu.matmul %47, %44, %cst_24 {dimension_numbers = #tpu.dot_dimension_numbers<[1], [1], [0], [0], [0, 0, 1, 0], [], []>} : vector<64x32xf32>, vector<10x32xf32>, vector<64x10xf32> -> vector<64x10xf32>
    %49 = arith.addf %48, %1 : vector<64x10xf32>
    %50 = math.exp %49 : vector<64x10xf32>
    %cst_25 = arith.constant dense<0.000000e+00> : vector<64xf32>
    %51 = vector.multi_reduction <add>, %50, %cst_25 [1] : vector<64x10xf32> to vector<64xf32>
    %52 = vector.shape_cast %51 : vector<64xf32> to vector<64x1xf32>
    %cst_26 = arith.constant dense<0.000000e+00> : vector<64x32xf32>
    %53 = tpu.matmul %50, %45, %cst_26 {dimension_numbers = #tpu.dot_dimension_numbers<[1], [0], [0], [1], [0, 0, 1, 1], [], []>} : vector<64x10xf32>, vector<10x32xf32>, vector<64x32xf32> -> vector<64x32xf32>
    %54 = tpu.reciprocal %52 {approx = true} : vector<64x1xf32> -> vector<64x1xf32>
    %55 = vector.broadcast %54 : vector<64x1xf32> to vector<64x32xf32>
    %56 = arith.mulf %53, %55 : vector<64x32xf32>
    %57 = arith.mulf %56, %2 : vector<64x32xf32>
    %cst_27 = arith.constant dense<0.000000e+00> : vector<10x32xf32>
    %58 = tpu.matmul %3, %57, %cst_27 {dimension_numbers = #tpu.dot_dimension_numbers<[1], [0], [0], [1], [0, 0, 1, 1], [], []>} : vector<10x64xf32>, vector<64x32xf32>, vector<10x32xf32> -> vector<10x32xf32>
    %cst_28 = arith.constant dense<0.000000e+00> : vector<10x32xf32>
    %59 = tpu.matmul %58, %20, %cst_28 {dimension_numbers = #tpu.dot_dimension_numbers<[1], [0], [0], [1], [0, 0, 1, 1], [], []>} : vector<10x32xf32>, vector<32x32xf32>, vector<10x32xf32> -> vector<10x32xf32>
    %60 = arith.addf %11, %59 : vector<10x32xf32>
    %61 = vector.broadcast %22 : vector<1x32xf32> to vector<10x32xf32>
    %62 = arith.addf %60, %61 : vector<10x32xf32>
    %cst_29 = arith.constant dense<0.000000e+00> : vector<10xf32>
    %63 = vector.multi_reduction <add>, %62, %cst_29 [1] : vector<10x32xf32> to vector<10xf32>
    %64 = vector.shape_cast %63 : vector<10xf32> to vector<10x1xf32>
    %cst_30 = arith.constant 3.200000e+01 : f32
    %65 = vector.broadcast %cst_30 : f32 to vector<10x1xf32>
    %66 = arith.divf %64, %65 : vector<10x1xf32>
    %67 = vector.broadcast %66 : vector<10x1xf32> to vector<10x32xf32>
    %68 = arith.subf %62, %67 : vector<10x32xf32>
    %69 = arith.mulf %68, %68 : vector<10x32xf32>
    %cst_31 = arith.constant dense<0.000000e+00> : vector<10xf32>
    %70 = vector.multi_reduction <add>, %69, %cst_31 [1] : vector<10x32xf32> to vector<10xf32>
    %71 = vector.shape_cast %70 : vector<10xf32> to vector<10x1xf32>
    %cst_32 = arith.constant 3.200000e+01 : f32
    %72 = vector.broadcast %cst_32 : f32 to vector<10x1xf32>
    %73 = arith.divf %71, %72 : vector<10x1xf32>
    %cst_33 = arith.constant 9.99999996E-13 : f32
    %74 = vector.broadcast %cst_33 : f32 to vector<10x1xf32>
    %75 = arith.addf %73, %74 : vector<10x1xf32>
    %76 = math.rsqrt %75 : vector<10x1xf32>
    %77 = vector.broadcast %76 : vector<10x1xf32> to vector<10x32xf32>
    %78 = arith.mulf %68, %77 : vector<10x32xf32>
    %cst_34 = arith.constant dense<0.000000e+00> : vector<10x64xf32>
    %79 = tpu.matmul %78, %18, %cst_34 {dimension_numbers = #tpu.dot_dimension_numbers<[1], [0], [0], [1], [0, 0, 1, 1], [], []>} : vector<10x32xf32>, vector<32x64xf32>, vector<10x64xf32> -> vector<10x64xf32>
    %80 = vector.broadcast %19 : vector<1x64xf32> to vector<10x64xf32>
    %81 = arith.addf %79, %80 : vector<10x64xf32>
    %cst_35 = arith.constant 5.000000e-01 : f32
    %82 = vector.broadcast %cst_35 : f32 to vector<10x64xf32>
    %83 = arith.mulf %82, %81 : vector<10x64xf32>
    %cst_36 = arith.constant 0.707106769 : f32
    %84 = vector.broadcast %cst_36 : f32 to vector<10x64xf32>
    %85 = arith.mulf %81, %84 : vector<10x64xf32>
    %86 = math.erf %85 : vector<10x64xf32>
    %cst_37 = arith.constant 1.000000e+00 : f32
    %87 = vector.broadcast %cst_37 : f32 to vector<10x64xf32>
    %88 = arith.addf %87, %86 : vector<10x64xf32>
    %89 = arith.mulf %83, %88 : vector<10x64xf32>
    %cst_38 = arith.constant dense<0.000000e+00> : vector<10x32xf32>
    %90 = tpu.matmul %89, %21, %cst_38 {dimension_numbers = #tpu.dot_dimension_numbers<[1], [0], [0], [1], [0, 0, 1, 1], [], []>} : vector<10x64xf32>, vector<64x32xf32>, vector<10x32xf32> -> vector<10x32xf32>
    %91 = arith.addf %62, %90 : vector<10x32xf32>
    %92 = vector.broadcast %23 : vector<1x32xf32> to vector<10x32xf32>
    %93 = arith.addf %91, %92 : vector<10x32xf32>
    %c1 = arith.constant 1 : index
    %c0_39 = arith.constant 0 : index
    %c0_40 = arith.constant 0 : index
    %94 = vector.load %arg1[%c1, %c0_39, %c0_40] : memref<2x40x448xf32, #tpu.memory_space<vmem>>, vector<1x40x448xf32>
    %95 = vector.shape_cast %94 : vector<1x40x448xf32> to vector<40x448xf32>
    %c1_41 = arith.constant 1 : index
    %c0_42 = arith.constant 0 : index
    %c0_43 = arith.constant 0 : index
    %96 = vector.load %arg2[%c1_41, %c0_42, %c0_43] : memref<2x112x32xf32, #tpu.memory_space<vmem>>, vector<1x112x32xf32>
    %97 = vector.shape_cast %96 : vector<1x112x32xf32> to vector<112x32xf32>
    %98 = vector.extract_strided_slice %95 {offsets = [0, 0], sizes = [32, 384], strides = [1, 1]} : vector<40x448xf32> to vector<32x384xf32>
    %99 = vector.extract_strided_slice %95 {offsets = [32, 0], sizes = [1, 384], strides = [1, 1]} : vector<40x448xf32> to vector<1x384xf32>
    %100 = vector.extract_strided_slice %95 {offsets = [0, 384], sizes = [32, 64], strides = [1, 1]} : vector<40x448xf32> to vector<32x64xf32>
    %101 = vector.extract_strided_slice %95 {offsets = [32, 384], sizes = [1, 64], strides = [1, 1]} : vector<40x448xf32> to vector<1x64xf32>
    %102 = vector.extract_strided_slice %97 {offsets = [0, 0], sizes = [32, 32], strides = [1, 1]} : vector<112x32xf32> to vector<32x32xf32>
    %103 = vector.extract_strided_slice %97 {offsets = [32, 0], sizes = [64, 32], strides = [1, 1]} : vector<112x32xf32> to vector<64x32xf32>
    %104 = vector.extract_strided_slice %97 {offsets = [96, 0], sizes = [1, 32], strides = [1, 1]} : vector<112x32xf32> to vector<1x32xf32>
    %105 = vector.extract_strided_slice %97 {offsets = [104, 0], sizes = [1, 32], strides = [1, 1]} : vector<112x32xf32> to vector<1x32xf32>
    %cst_44 = arith.constant dense<0.000000e+00> : vector<10xf32>
    %106 = vector.multi_reduction <add>, %93, %cst_44 [1] : vector<10x32xf32> to vector<10xf32>
    %107 = vector.shape_cast %106 : vector<10xf32> to vector<10x1xf32>
    %cst_45 = arith.constant 3.200000e+01 : f32
    %108 = vector.broadcast %cst_45 : f32 to vector<10x1xf32>
    %109 = arith.divf %107, %108 : vector<10x1xf32>
    %110 = vector.broadcast %109 : vector<10x1xf32> to vector<10x32xf32>
    %111 = arith.subf %93, %110 : vector<10x32xf32>
    %112 = arith.mulf %111, %111 : vector<10x32xf32>
    %cst_46 = arith.constant dense<0.000000e+00> : vector<10xf32>
    %113 = vector.multi_reduction <add>, %112, %cst_46 [1] : vector<10x32xf32> to vector<10xf32>
    %114 = vector.shape_cast %113 : vector<10xf32> to vector<10x1xf32>
    %cst_47 = arith.constant 3.200000e+01 : f32
    %115 = vector.broadcast %cst_47 : f32 to vector<10x1xf32>
    %116 = arith.divf %114, %115 : vector<10x1xf32>
    %cst_48 = arith.constant 9.99999996E-13 : f32
    %117 = vector.broadcast %cst_48 : f32 to vector<10x1xf32>
    %118 = arith.addf %116, %117 : vector<10x1xf32>
    %119 = math.rsqrt %118 : vector<10x1xf32>
    %120 = vector.broadcast %119 : vector<10x1xf32> to vector<10x32xf32>
    %121 = arith.mulf %111, %120 : vector<10x32xf32>
    %cst_49 = arith.constant dense<0.000000e+00> : vector<10x384xf32>
    %122 = tpu.matmul %121, %98, %cst_49 {dimension_numbers = #tpu.dot_dimension_numbers<[1], [0], [0], [1], [0, 0, 1, 1], [], []>} : vector<10x32xf32>, vector<32x384xf32>, vector<10x384xf32> -> vector<10x384xf32>
    %123 = vector.broadcast %99 : vector<1x384xf32> to vector<10x384xf32>
    %124 = arith.addf %122, %123 : vector<10x384xf32>
    %125 = vector.extract_strided_slice %124 {offsets = [0, 0], sizes = [10, 32], strides = [1, 1]} : vector<10x384xf32> to vector<10x32xf32>
    %126 = vector.extract_strided_slice %124 {offsets = [0, 128], sizes = [10, 32], strides = [1, 1]} : vector<10x384xf32> to vector<10x32xf32>
    %127 = vector.extract_strided_slice %124 {offsets = [0, 256], sizes = [10, 32], strides = [1, 1]} : vector<10x384xf32> to vector<10x32xf32>
    %cst_50 = arith.constant dense<0.000000e+00> : vector<64x32xf32>
    %128 = tpu.matmul %0, %125, %cst_50 {dimension_numbers = #tpu.dot_dimension_numbers<[1], [0], [0], [1], [0, 0, 1, 1], [], []>} : vector<64x10xf32>, vector<10x32xf32>, vector<64x32xf32> -> vector<64x32xf32>
    %129 = arith.mulf %128, %2 : vector<64x32xf32>
    %cst_51 = arith.constant dense<0.000000e+00> : vector<64x10xf32>
    %130 = tpu.matmul %129, %126, %cst_51 {dimension_numbers = #tpu.dot_dimension_numbers<[1], [1], [0], [0], [0, 0, 1, 0], [], []>} : vector<64x32xf32>, vector<10x32xf32>, vector<64x10xf32> -> vector<64x10xf32>
    %131 = arith.addf %130, %1 : vector<64x10xf32>
    %132 = math.exp %131 : vector<64x10xf32>
    %cst_52 = arith.constant dense<0.000000e+00> : vector<64xf32>
    %133 = vector.multi_reduction <add>, %132, %cst_52 [1] : vector<64x10xf32> to vector<64xf32>
    %134 = vector.shape_cast %133 : vector<64xf32> to vector<64x1xf32>
    %cst_53 = arith.constant dense<0.000000e+00> : vector<64x32xf32>
    %135 = tpu.matmul %132, %127, %cst_53 {dimension_numbers = #tpu.dot_dimension_numbers<[1], [0], [0], [1], [0, 0, 1, 1], [], []>} : vector<64x10xf32>, vector<10x32xf32>, vector<64x32xf32> -> vector<64x32xf32>
    %136 = tpu.reciprocal %134 {approx = true} : vector<64x1xf32> -> vector<64x1xf32>
    %137 = vector.broadcast %136 : vector<64x1xf32> to vector<64x32xf32>
    %138 = arith.mulf %135, %137 : vector<64x32xf32>
    %139 = arith.mulf %138, %2 : vector<64x32xf32>
    %cst_54 = arith.constant dense<0.000000e+00> : vector<10x32xf32>
    %140 = tpu.matmul %3, %139, %cst_54 {dimension_numbers = #tpu.dot_dimension_numbers<[1], [0], [0], [1], [0, 0, 1, 1], [], []>} : vector<10x64xf32>, vector<64x32xf32>, vector<10x32xf32> -> vector<10x32xf32>
    %cst_55 = arith.constant dense<0.000000e+00> : vector<10x32xf32>
    %141 = tpu.matmul %140, %102, %cst_55 {dimension_numbers = #tpu.dot_dimension_numbers<[1], [0], [0], [1], [0, 0, 1, 1], [], []>} : vector<10x32xf32>, vector<32x32xf32>, vector<10x32xf32> -> vector<10x32xf32>
    %142 = arith.addf %93, %141 : vector<10x32xf32>
    %143 = vector.broadcast %104 : vector<1x32xf32> to vector<10x32xf32>
    %144 = arith.addf %142, %143 : vector<10x32xf32>
    %cst_56 = arith.constant dense<0.000000e+00> : vector<10xf32>
    %145 = vector.multi_reduction <add>, %144, %cst_56 [1] : vector<10x32xf32> to vector<10xf32>
    %146 = vector.shape_cast %145 : vector<10xf32> to vector<10x1xf32>
    %cst_57 = arith.constant 3.200000e+01 : f32
    %147 = vector.broadcast %cst_57 : f32 to vector<10x1xf32>
    %148 = arith.divf %146, %147 : vector<10x1xf32>
    %149 = vector.broadcast %148 : vector<10x1xf32> to vector<10x32xf32>
    %150 = arith.subf %144, %149 : vector<10x32xf32>
    %151 = arith.mulf %150, %150 : vector<10x32xf32>
    %cst_58 = arith.constant dense<0.000000e+00> : vector<10xf32>
    %152 = vector.multi_reduction <add>, %151, %cst_58 [1] : vector<10x32xf32> to vector<10xf32>
    %153 = vector.shape_cast %152 : vector<10xf32> to vector<10x1xf32>
    %cst_59 = arith.constant 3.200000e+01 : f32
    %154 = vector.broadcast %cst_59 : f32 to vector<10x1xf32>
    %155 = arith.divf %153, %154 : vector<10x1xf32>
    %cst_60 = arith.constant 9.99999996E-13 : f32
    %156 = vector.broadcast %cst_60 : f32 to vector<10x1xf32>
    %157 = arith.addf %155, %156 : vector<10x1xf32>
    %158 = math.rsqrt %157 : vector<10x1xf32>
    %159 = vector.broadcast %158 : vector<10x1xf32> to vector<10x32xf32>
    %160 = arith.mulf %150, %159 : vector<10x32xf32>
    %cst_61 = arith.constant dense<0.000000e+00> : vector<10x64xf32>
    %161 = tpu.matmul %160, %100, %cst_61 {dimension_numbers = #tpu.dot_dimension_numbers<[1], [0], [0], [1], [0, 0, 1, 1], [], []>} : vector<10x32xf32>, vector<32x64xf32>, vector<10x64xf32> -> vector<10x64xf32>
    %162 = vector.broadcast %101 : vector<1x64xf32> to vector<10x64xf32>
    %163 = arith.addf %161, %162 : vector<10x64xf32>
    %cst_62 = arith.constant 5.000000e-01 : f32
    %164 = vector.broadcast %cst_62 : f32 to vector<10x64xf32>
    %165 = arith.mulf %164, %163 : vector<10x64xf32>
    %cst_63 = arith.constant 0.707106769 : f32
    %166 = vector.broadcast %cst_63 : f32 to vector<10x64xf32>
    %167 = arith.mulf %163, %166 : vector<10x64xf32>
    %168 = math.erf %167 : vector<10x64xf32>
    %cst_64 = arith.constant 1.000000e+00 : f32
    %169 = vector.broadcast %cst_64 : f32 to vector<10x64xf32>
    %170 = arith.addf %169, %168 : vector<10x64xf32>
    %171 = arith.mulf %165, %170 : vector<10x64xf32>
    %cst_65 = arith.constant dense<0.000000e+00> : vector<10x32xf32>
    %172 = tpu.matmul %171, %103, %cst_65 {dimension_numbers = #tpu.dot_dimension_numbers<[1], [0], [0], [1], [0, 0, 1, 1], [], []>} : vector<10x64xf32>, vector<64x32xf32>, vector<10x32xf32> -> vector<10x32xf32>
    %173 = arith.addf %144, %172 : vector<10x32xf32>
    %174 = vector.broadcast %105 : vector<1x32xf32> to vector<10x32xf32>
    %175 = arith.addf %173, %174 : vector<10x32xf32>
    %cst_66 = arith.constant dense<0.000000e+00> : vector<2x32xf32>
    %176 = tpu.matmul %4, %175, %cst_66 {dimension_numbers = #tpu.dot_dimension_numbers<[1], [0], [0], [1], [0, 0, 1, 1], [], []>} : vector<2x10xf32>, vector<10x32xf32>, vector<2x32xf32> -> vector<2x32xf32>
    %cst_67 = arith.constant dense<0.000000e+00> : vector<2xf32>
    %177 = vector.multi_reduction <add>, %176, %cst_67 [1] : vector<2x32xf32> to vector<2xf32>
    %178 = vector.shape_cast %177 : vector<2xf32> to vector<2x1xf32>
    %cst_68 = arith.constant 3.200000e+01 : f32
    %179 = vector.broadcast %cst_68 : f32 to vector<2x1xf32>
    %180 = arith.divf %178, %179 : vector<2x1xf32>
    %181 = vector.broadcast %180 : vector<2x1xf32> to vector<2x32xf32>
    %182 = arith.subf %176, %181 : vector<2x32xf32>
    %183 = arith.mulf %182, %182 : vector<2x32xf32>
    %cst_69 = arith.constant dense<0.000000e+00> : vector<2xf32>
    %184 = vector.multi_reduction <add>, %183, %cst_69 [1] : vector<2x32xf32> to vector<2xf32>
    %185 = vector.shape_cast %184 : vector<2xf32> to vector<2x1xf32>
    %cst_70 = arith.constant 3.200000e+01 : f32
    %186 = vector.broadcast %cst_70 : f32 to vector<2x1xf32>
    %187 = arith.divf %185, %186 : vector<2x1xf32>
    %cst_71 = arith.constant 9.99999996E-13 : f32
    %188 = vector.broadcast %cst_71 : f32 to vector<2x1xf32>
    %189 = arith.addf %187, %188 : vector<2x1xf32>
    %190 = math.rsqrt %189 : vector<2x1xf32>
    %191 = vector.broadcast %190 : vector<2x1xf32> to vector<2x32xf32>
    %192 = arith.mulf %182, %191 : vector<2x32xf32>
    %193 = vector.broadcast %7 : vector<1x32xf32> to vector<2x32xf32>
    %194 = arith.mulf %192, %193 : vector<2x32xf32>
    %cst_72 = arith.constant dense<0.000000e+00> : vector<2xf32>
    %195 = vector.multi_reduction <add>, %194, %cst_72 [1] : vector<2x32xf32> to vector<2xf32>
    %196 = vector.shape_cast %195 : vector<2xf32> to vector<2x1xf32>
    %197 = vector.broadcast %8 : vector<1x1xf32> to vector<2x1xf32>
    %198 = arith.addf %196, %197 : vector<2x1xf32>
    %199 = arith.negf %198 : vector<2x1xf32>
    %200 = math.exp %199 : vector<2x1xf32>
    %cst_73 = arith.constant 1.000000e+00 : f32
    %201 = vector.broadcast %cst_73 : f32 to vector<2x1xf32>
    %202 = arith.addf %201, %200 : vector<2x1xf32>
    %203 = arith.divf %201, %202 : vector<2x1xf32>
    %c0_74 = arith.constant 0 : index
    %c0_75 = arith.constant 0 : index
    %204 = vector.load %arg4[%c0_74, %c0_75] : memref<2x1xf32, #tpu.memory_space<vmem>>, vector<2x1xf32>
    tpu.vector_store %arg4[%c0_74, %c0_75], %203 {strides = array<i32>} : memref<2x1xf32, #tpu.memory_space<vmem>>, vector<2x1xf32>,
    return
  }
}

</mosaic_0001>

<bundles_post_ra>
// kernel: vit_binary_classifier.1
= control target key start
LH: loop header
LB: loop body
LE: loop exit
PB: predicated region body
PF: predicated region fallthrough
CT: control target
= control target key end

     0   :  { %v3220_v0 = vmov 0.0|0.0   ;;  %vm76_vm0 = vcmask 523264   ;;  %vm192_vm1 = vcmask 261120   ;;  %vm196_vm2 = vcmask 254976   ;;  %s3975_s3 = inlined_call_operand.vmem [shape: f32[440,64], index: 3, kind: input, shape index: {}]   ;;  %s3976_s0 = inlined_call_operand.vmem [shape: f32[10,192], index: 0, kind: input, shape index: {}]   ;;  %s3977_s1 = inlined_call_operand.vmem [shape: f32[2,40,448], index: 1, kind: input, shape index: {}]   ;;  %s3978_s2 = inlined_call_operand.vmem [shape: f32[2,112,32], index: 2, kind: input, shape index: {}]   ;;  %s3979_s4 = inlined_call_operand.vmem [shape: f32[2,1], index: 4, kind: output, shape index: {}]  }
   0x1   :  { %2916 = vmatprep.subr.bf16.mxu0 %v3220_v0  ;;  %v44_v1 = vld [vmem:[%s3975_s3 + $0xd8] sm:$0xff]  ;;  %v45_v2 = vld [vmem:[%s3975_s3 + $0xe0] sm:$0xff]  ;;  %v46_v3 = vld [vmem:[%s3975_s3 + $0xe8] sm:$0xff]  ;;  %vm391_vm3 = vcmask 80896   ;;  %vm416_vm4 = vcmask 1041408   ;;  %vm3222_vm5 = vmmov 1  }
   0x2   :  { %v2917_v4 = vpack.c.bf16 %v45_v2, %v44_v1  ;;  %v47_v5 = vld [vmem:[%s3975_s3 + $0xf0] sm:$0xff]  ;;  %v48_v7 = vld [vmem:[%s3975_s3 + $0xf8] sm:$0xff]  ;;  %v49_v8 = vld [vmem:[%s3975_s3 + $0x100] sm:$0xff]  ;;  %vm3223_vm8 = vmmov 0   ;;  %vm2405_vm9 = vcmask 1024  }
   0x3   :  { %v2920_v6 = vpack.c.bf16 %v47_v5, %v46_v3  ;;  %v2923_v9 = vpack.c.bf16 %v49_v8, %v48_v7  ;;  %v50_v10 = vld [vmem:[%s3975_s3 + $0x108] sm:$0xff]  ;;  %v51_v11 = vld [vmem:[%s3975_s3 + $0x110] sm:$0xff]  ;;  %v52_v14 = vld [vmem:[%s3975_s3 + $0x118] sm:$0xff] }
   0x4   :  { %2918 = vmatpush1.bf16.msra.mxu0 %v2917_v4  ;;  %v73_v12 = vld [vmem:[%s3976_s0 + $0x8] sm:$0xff]  ;;  %v2926_v13 = vpack.c.bf16 %v51_v11, %v50_v10  ;;  %v53_v15 = vld [vmem:[%s3975_s3 + $0x120] sm:$0xff]  ;;  %v55_v18 = vld [vmem:[%s3975_s3 + $0x130] sm:$0xff] }
   0x5   :  { %2919 = vmatprep.subr.bf16.mxu0 %v3220_v0  ;;  %2411 = vmatprep.mubr.msk.f32.mxu0 %vm76_vm0, %v73_v12  ;;  %v2929_v16 = vpack.c.bf16 %v53_v15, %v52_v14  ;;  %v54_v17 = vld [vmem:[%s3975_s3 + $0x128] sm:$0xff]  ;;  %v56_v20 = vld [vmem:[%s3975_s3 + $0x138] sm:$0xff]  ;;  %v57_v21 = vld [vmem:[%s3975_s3 + $0x140] sm:$0xff] }
   0x6   :  { %v2932_v19 = vpack.c.bf16 %v55_v18, %v54_v17  ;;  %v2935_v22 = vpack.c.bf16 %v57_v21, %v56_v20  ;;  %v58_v23 = vld [vmem:[%s3975_s3 + $0x148] sm:$0xff]  ;;  %v59_v24 = vld [vmem:[%s3975_s3 + $0x150] sm:$0xff]  ;;  %v60_v26 = vld [vmem:[%s3975_s3 + $0x158] sm:$0xff] }
   0x7   :  { %v2938_v25 = vpack.c.bf16 %v59_v24, %v58_v23  ;;  %v61_v27 = vld [vmem:[%s3975_s3 + $0x160] sm:$0xff]  ;;  %v62_v29 = vld [vmem:[%s3975_s3 + $0x168] sm:$0xff]  ;;  %v63_v30 = vld [vmem:[%s3975_s3 + $0x170] sm:$0xff] }
   0x8   :  { %2921 = vmatpush1.bf16.msra.mxu0 %v2920_v6  ;;  %v2941_v28 = vpack.c.bf16 %v61_v27, %v60_v26  ;;  %v2944_v31 = vpack.c.bf16 %v63_v30, %v62_v29  ;;  %v64_v32 = vld [vmem:[%s3975_s3 + $0x178] sm:$0xff]  ;;  %v65_v33 = vld [vmem:[%s3975_s3 + $0x180] sm:$0xff]  ;;  %v66_v35 = vld [vmem:[%s3975_s3 + $0x188] sm:$0xff] }
   0x9   :  { %2922 = vmatprep.subr.bf16.mxu0 %v3220_v0  ;;  %v2947_v34 = vpack.c.bf16 %v65_v33, %v64_v32  ;;  %v67_v36 = vld [vmem:[%s3975_s3 + $0x190] sm:$0xff]  ;;  %v72_v38 = vld [vmem:[%s3976_s0] sm:$0xff]  ;;  %v75_v39 = vld [vmem:[%s3976_s0 + $0x18] sm:$0x3] }
   0xa   :  { %v2950_v37 = vpack.c.bf16 %v67_v36, %v66_v35  ;;  %v74_v40 = vld [vmem:[%s3976_s0 + $0x10] sm:$0x3]  ;;  %v68_v41 = vld [vmem:[%s3975_s3 + $0x198] sm:$0xff]  ;;  %v69_v45 = vld [vmem:[%s3975_s3 + $0x1a0] sm:$0x3] }
   0xb   :  { %v159_v61 = vld [vmem:[%s3977_s1 + $0x8] sm:$0xff]  ;;  %v158_v1 = vld [vmem:[%s3977_s1] sm:$0xff]  ;;  %v160_v11 = vld [vmem:[%s3977_s1 + $0x10] sm:$0xff] }
   0xc   :  { %2924 = vmatpush1.bf16.msra.mxu0 %v2923_v9  ;;  %v163_v62 = vld [vmem:[%s3977_s1 + $0x28] sm:$0xff]  ;;  %v162_v2 = vld [vmem:[%s3977_s1 + $0x20] sm:$0xff]  ;;  %v3221_v9 = vmov 0.0   ;;  %v164_v12 = vld [vmem:[%s3977_s1 + $0x30] sm:$0xff] }
   0xd   :  { %2925 = vmatprep.subr.bf16.mxu0 %v3220_v0  ;;  %v2952_v63 = vpack.c.bf16 %v163_v62, %v159_v61  ;;  %v2954_v3 = vpack.c.bf16 %v162_v2, %v158_v1  ;;  %v167_v4 = vld [vmem:[%s3977_s1 + $0x48] sm:$0xff]  ;;  %v166_v6 = vld [vmem:[%s3977_s1 + $0x40] sm:$0xff]  ;;  %303 = vmatprep.mubr.f32.mxu1 %v3221_v9  ;;  %v168_v20 = vld [vmem:[%s3977_s1 + $0x50] sm:$0xff] }
   0xe   :  { %v171_v5 = vld [vmem:[%s3977_s1 + $0x68] sm:$0xff]  ;;  %v170_v8 = vld [vmem:[%s3977_s1 + $0x60] sm:$0xff]  ;;  %v172_v21 = vld [vmem:[%s3977_s1 + $0x70] sm:$0xff] }
   0xf   :  { %2953 = vmatprep.subr.bf16.mxu1 %v2952_v63  ;;  %v2956_v7 = vpack.c.bf16 %v171_v5, %v167_v4  ;;  %v2958_v10 = vpack.c.bf16 %v170_v8, %v166_v6  ;;  %v2964_v24 = vpack.c.bf16 %v172_v21, %v168_v20  ;;  %v3410_v27 = vld [vmem:[%s3975_s3] sm:$0xff]  ;;  %v175_v32 = vld [vmem:[%s3977_s1 + $0x88] sm:$0xff]  ;;  %vm3428_vm6 = vmpackc.low %vm416_vm4, %vm3222_vm5 }
  0x10   :  { %2927 = vmatpush1.bf16.msra.mxu0 %v2926_v13  ;;  %2955 = vmatpush1.bf16.msra.mxu1 %v2954_v3  ;;  %v2960_v13 = vpack.c.bf16 %v164_v12, %v160_v11  ;;  %vm3434_vm7 = vmpackc.low %vm192_vm1, %vm192_vm1  ;;  %v3482_v61 = vld [vmem:[%s3975_s3 + $0x30] sm:$0xff]  ;;  %v3493_v62 = vld [vmem:[%s3975_s3 + $0x38] sm:$0xff] }
  0x11   :  { %2928 = vmatprep.subr.bf16.mxu0 %v3220_v0  ;;  %2957 = vmatprep.subr.bf16.mxu1 %v2956_v7  ;;  %v3500_v63 = vld [vmem:[%s3975_s3 + $0x80] sm:$0xff]  ;;  %v3505_v1 = vld [vmem:[%s3975_s3 + $0x88] sm:$0xff]  ;;  %v3512_v6 = vld [vmem:[%s3975_s3 + $0x90] sm:$0xff] }
  0x12   :  { %v3517_v7 = vld [vmem:[%s3975_s3 + $0x98] sm:$0xff] }
  0x13   :  { %v3547_v20 = vld [vmem:[%s3975_s3 + $0xb8] sm:$0xff] }
  0x14   :  { %2930 = vmatpush1.bf16.msra.mxu0 %v2929_v16  ;;  %2959 = vmatpush1.bf16.msra.mxu1 %v2958_v10 }
  0x15   :  { %2931 = vmatprep.subr.bf16.mxu0 %v3220_v0  ;;  %2961 = vmatprep.subr.bf16.mxu1 %v2960_v13 }
  0x18   :  { %2933 = vmatpush1.bf16.msra.mxu0 %v2932_v19 }
  0x19   :  { %2934 = vmatprep.subr.bf16.mxu0 %v3220_v0 }
  0x1c   :  { %2936 = vmatpush1.bf16.msra.mxu0 %v2935_v22 }
  0x1d   :  { %2937 = vmatprep.subr.bf16.mxu0 %v3220_v0 }
  0x20   :  { %2939 = vmatpush1.bf16.msra.mxu0 %v2938_v25 }
  0x21   :  { %2940 = vmatprep.subr.bf16.mxu0 %v3220_v0 }
  0x24   :  { %2942 = vmatpush1.bf16.msra.mxu0 %v2941_v28  ;;  %v221_v28 = vlaneseq }
  0x25   :  { %2943 = vmatprep.subr.bf16.mxu0 %v3220_v0 }
  0x26   :  { %v222_v29 = vshrl.u32 %v221_v28, 7 }
  0x28   :  { %2945 = vmatpush1.bf16.msra.mxu0 %v2944_v31  ;;  %v3414_v30 = vsub.s32 0, %v222_v29  ;;  %v174_v31 = vld [vmem:[%s3977_s1 + $0x80] sm:$0xff] }
  0x29   :  { %2946 = vmatprep.subr.bf16.mxu0 %v3220_v0 }
  0x2a   :  { %v228_v36 = vrot.slane %v175_v32, %v3414_v30 }
  0x2c   :  { %2948 = vmatpush1.bf16.msra.mxu0 %v2947_v34  ;;  %v224_v34 = vrot.slane %v174_v31, %v3414_v30 }
  0x2d   :  { %2949 = vmatprep.subr.bf16.mxu0 %v3220_v0 }
  0x30   :  { %2951 = vmatpush1.bf16.msra.mxu0 %v2950_v37  ;;  %v176_v37 = vld [vmem:[%s3977_s1 + $0x90] sm:$0xff] }
  0x33   :  { %148 = vmatmul.mubr.f32.vlgmr.msra.gmra.mrb[0].mxu0 %v72_v38 }
  0x34   :  { %2412 = vmatprep.mubr.msk.f32.mxu0 %vm76_vm0, %v75_v39 }
  0x37   :  { %153 = vmatmul.mubr.f32.gmra.mrb[2].mxu0 %v74_v40 }
 0x106   :  { %v149_v42 = vpop.f32.mrb[0].mxu0 }
 0x107   :  { %v3350_v43 = vadd.f32 %v149_v42, %v68_v41  ;;  %v151_v44 = vpop.f32.mrb[1].mxu0  ;;  %v232_v42 = vrot.slane %v176_v37, %v3414_v30 }
 0x109   :  { %v193_v46 = vsel %vm192_vm1, %v3350_v43, 0.0 }
 0x10a   :  { %v154_v47 = vpop.f32.mrb[2].mxu0  ;;  %194 = vadd.xlane.f32.xlu0 %v193_v46 }
 0x10b   :  { %v3357_v48 = vadd.f32 %v154_v47, %v69_v45  ;;  %v156_v49 = vpop.f32.mrb[3].mxu0 }
 0x10d   :  { %v197_v50 = vsel %vm196_vm2, %v3357_v48, 0.0 }
 0x10e   :  { %198 = vadd.xlane.f32.xlu0 %v197_v50 }
 0x197   :  { %v195_v51 = vpop.xlane.xlu0 %194 }
 0x198   :  { %v201_v52 = vmul.f32 0.03125, %v195_v51 }
 0x19a   :  { %v203_v53 = vsub.f32 %v3350_v43, %v201_v52 }
 0x19b   :  { %v199_v54 = vpop.xlane.xlu0 %198 }
 0x19c   :  { %v202_v55 = vmul.f32 0.03125, %v199_v54  ;;  %v205_v56 = vmul.f32 %v203_v53, %v203_v53 }
 0x19e   :  { %v204_v57 = vsub.f32 %v3357_v48, %v202_v55  ;;  %v207_v58 = vsel %vm192_vm1, %v205_v56, 0.0  ;;  %v3445_v55 = vld [vmem:[%s3975_s3 + $0x8] sm:$0xff]  ;;  %v3452_v56 = vld [vmem:[%s3975_s3 + $0x10] sm:$0xff] }
 0x19f   :  { %208 = vadd.xlane.f32.xlu1 %v207_v58  ;;  %v3461_v58 = vld [vmem:[%s3975_s3 + $0x18] sm:$0xff] }
 0x1a0   :  { %v206_v59 = vmul.f32 %v204_v57, %v204_v57 }
 0x1a2   :  { %v210_v60 = vsel %vm196_vm2, %v206_v59, 0.0  ;;  %v3466_v59 = vld [vmem:[%s3975_s3 + $0x20] sm:$0xff] }
 0x1a3   :  { %211 = vadd.xlane.f32.xlu1 %v210_v60  ;;  %v3475_v60 = vld [vmem:[%s3975_s3 + $0x28] sm:$0xff] }
 0x22c   :  { %v209_v14 = vpop.xlane.xlu1 %208 }
 0x22d   :  { %v213_v15 = vmul.f32 0.03125, %v209_v14  ;;  %v3533_v14 = vld [vmem:[%s3975_s3 + $0xa8] sm:$0xff] }
 0x22f   :  { %v215_v16 = vadd.f32 1e-12, %v213_v15 }
 0x230   :  { %v212_v17 = vpop.xlane.xlu1 %211 }
 0x231   :  { %3126 = vrsqrt.f32 %v215_v16  ;;  %v214_v18 = vmul.f32 0.03125, %v212_v17 }
 0x233   :  { %v216_v19 = vadd.f32 1e-12, %v214_v18 }
 0x235   :  { %3128 = vrsqrt.f32 %v216_v19  ;;  %v3542_v19 = vld [vmem:[%s3975_s3 + $0xb0] sm:$0xff] }
 0x23b   :  { %v3127_v22 = vpop.eup %3126 }
 0x23c   :  { %v219_v23 = vmul.f32 %v3127_v22, %v203_v53 }
 0x23e   :  { %2413 = vmatmul.mubr.msk.f32.vlgmr.msra.gmra.mrb[0].mxu1 %vm192_vm1, %v219_v23 }
 0x23f   :  { %v3129_v25 = vpop.eup %3128  ;;  %2963 = vmatpush3.bf16.msra.mxu1 %v2960_v13  ;;  %309 = vmatprep.mubr.f32.mxu1 %v3221_v9  ;;  %v3528_v13 = vld [vmem:[%s3975_s3 + $0xa0] sm:$0xff] }
 0x240   :  { %v220_v26 = vmul.f32 %v3129_v25, %v204_v57  ;;  %2965 = vmatprep.subr.bf16.mxu1 %v2964_v24  ;;  %v3558_v25 = vld [vmem:[%s3975_s3 + $0x48] sm:$0xff] }
 0x242   :  { %2414 = vmatmul.mubr.msk.f32.gmra.mrb[2].mxu1 %vm192_vm1, %v220_v26 }
 0x243   :  { %2967 = vmatpush3.bf16.msra.mxu1 %v2964_v24  ;;  %2679 = vmatprep.mubr.msk.f32.mxu1 %vm192_vm1, %v219_v23 }
 0x246   :  { %2680 = vmatmul.mubr.msk.f32.vlgmr.msra.gmra.mrb[4].mxu1 %vm192_vm1, %v220_v26  ;;  %v3563_v26 = vld [vmem:[%s3975_s3 + $0x40] sm:$0xff] }
 0x247   :  { %2686 = vmatprep.mubr.msk.f32.mxu1 %vm391_vm3, %v3410_v27 }
 0x311   :  { %v305_v33 = vpop.f32.mrb[0].mxu1 }
 0x312   :  { %v307_v35 = vpop.f32.mrb[1].mxu1  ;;  %v306_v39 = vadd.f32 %v305_v33, %v224_v34  ;;  %v3570_v33 = vld [vmem:[%s3975_s3 + $0x58] sm:$0xff] }
 0x313   :  { %v308_v44 = vadd.f32 %v307_v35, %v228_v36  ;;  %v3575_v35 = vld [vmem:[%s3975_s3 + $0x50] sm:$0xff] }
 0x315   :  { %v311_v38 = vpop.f32.mrb[2].mxu1 }
 0x316   :  { %v312_v40 = vadd.f32 %v311_v38, %v224_v34  ;;  %v313_v41 = vpop.f32.mrb[3].mxu1 }
 0x317   :  { %v314_v45 = vadd.f32 %v313_v41, %v228_v36  ;;  %v3582_v41 = vld [vmem:[%s3975_s3 + $0x68] sm:$0xff] }
 0x318   :  { %v2968_v47 = vpack.c.bf16 %v312_v40, %v306_v39 }
 0x319   :  { %v2974_v49 = vpack.c.bf16 %v314_v45, %v308_v44  ;;  %v2681_v50 = vpop.f32.mrb[4].mxu1  ;;  %v3587_v44 = vld [vmem:[%s3975_s3 + $0x60] sm:$0xff] }
 0x31a   :  { %v388_v52 = vadd.f32 %v2681_v50, %v232_v42  ;;  %v382_v53 = vpop.f32.mrb[5].mxu1  ;;  %2970 = vmatprep.subr.msk.bf16.mxu1 %vm3428_vm6, %v2968_v47 }
 0x31b   :  { %v383_v54 = vadd.f32 %v382_v53, %v232_v42  ;;  %2973 = vmatpush3.bf16.msk.msra.mxu1 %vm3428_vm6, %v2968_v47  ;;  %v3594_v53 = vld [vmem:[%s3975_s3 + $0x78] sm:$0xff] }
 0x31c   :  { %2976 = vmatprep.subr.msk.bf16.mxu1 %vm3434_vm7, %v2974_v49 }
 0x31d   :  { %v2980_v57 = vpack.c.bf16 %v388_v52, %v383_v54 }
 0x31e   :  { %2687 = vmatmul.mubr.msk.f32.vlgmr.msra.gmra.mrb[6].mxu1 %vm391_vm3, %v3445_v55 }
 0x31f   :  { %2689 = vmatprep.mubr.msk.f32.mxu1 %vm391_vm3, %v3452_v56 }
 0x322   :  { %2690 = vmatmul.mubr.msk.f32.gmra.mrb[8].mxu1 %vm391_vm3, %v3461_v58 }
 0x323   :  { %2692 = vmatprep.mubr.msk.f32.mxu1 %vm391_vm3, %v3466_v59 }
 0x324   :  { %2979 = vmatpush3.bf16.xpose.msk.msra.mxu1 %vm3434_vm7, %v2974_v49 }
 0x325   :  { %2982 = vmatprep.subr.msk.bf16.mxu1 %vm3428_vm6, %v2980_v57 }
 0x326   :  { %2693 = vmatmul.mubr.msk.f32.gmra.mrb[10].mxu1 %vm391_vm3, %v3475_v60 }
 0x327   :  { %2695 = vmatprep.mubr.msk.f32.mxu1 %vm391_vm3, %v3482_v61 }
 0x32a   :  { %2696 = vmatmul.mubr.msk.f32.gmra.mrb[12].mxu1 %vm391_vm3, %v3493_v62 }
 0x3f1   :  { %v2688_v2 = vpop.f32.mrb[6].mxu1 }
 0x3f2   :  { %v486_v3 = vpop.f32.mrb[7].mxu1  ;;  %v526_v5 = vmul.f32 %v2688_v2, %v3505_v1 }
 0x3f3   :  { %v525_v4 = vmul.f32 %v486_v3, %v3500_v63 }
 0x3f5   :  { %v2691_v8 = vpop.f32.mrb[8].mxu1  ;;  %2702 = vmatprep.mubr.msk.f32.mxu1 %vm192_vm1, %v525_v4 }
 0x3f6   :  { %v496_v10 = vpop.f32.mrb[9].mxu1  ;;  %2703 = vmatmul.mubr.msk.f32.vlgmr.msra.gmra.mrb[14].mxu1 %vm192_vm1, %v526_v5  ;;  %v528_v12 = vmul.f32 %v2691_v8, %v3517_v7 }
 0x3f7   :  { %v527_v11 = vmul.f32 %v496_v10, %v3512_v6  ;;  %2985 = vmatpush3.bf16.msk.msra.mxu1 %vm3428_vm6, %v2980_v57  ;;  %v3599_v57 = vld [vmem:[%s3975_s3 + $0x70] sm:$0xff] }
 0x3f9   :  { %v2694_v15 = vpop.f32.mrb[10].mxu1  ;;  %2705 = vmatprep.mubr.msk.f32.mxu1 %vm192_vm1, %v527_v11 }
 0x3fa   :  { %v506_v16 = vpop.f32.mrb[11].mxu1  ;;  %2706 = vmatmul.mubr.msk.f32.gmra.mrb[16].mxu1 %vm192_vm1, %v528_v12  ;;  %v530_v18 = vmul.f32 %v2694_v15, %v3533_v14 }
 0x3fb   :  { %v529_v17 = vmul.f32 %v506_v16, %v3528_v13 }
 0x3fd   :  { %v2697_v21 = vpop.f32.mrb[12].mxu1  ;;  %2708 = vmatprep.mubr.msk.f32.mxu1 %vm192_vm1, %v529_v17 }
 0x3fe   :  { %v516_v22 = vpop.f32.mrb[13].mxu1  ;;  %2709 = vmatmul.mubr.msk.f32.gmra.mrb[18].mxu1 %vm192_vm1, %v530_v18  ;;  %v532_v24 = vmul.f32 %v2697_v21, %v3547_v20 }
 0x3ff   :  { %v531_v23 = vmul.f32 %v516_v22, %v3542_v19 }
 0x401   :  { %2711 = vmatprep.mubr.msk.f32.mxu1 %vm192_vm1, %v531_v23 }
 0x402   :  { %2712 = vmatmul.mubr.msk.f32.gmra.mrb[20].mxu1 %vm192_vm1, %v532_v24 }
 0x4c9   :  { %v2704_v28 = vpop.f32.mrb[14].mxu1 }
 0x4ca   :  { %v635_v29 = vadd.f32 %v2704_v28, %v3558_v25  ;;  %v629_v31 = vpop.f32.mrb[15].mxu1 }
 0x4cb   :  { %v630_v32 = vadd.f32 %v629_v31, %v3563_v26 }
 0x4cc   :  { %v670_v34 = vmul.f32 1.442695, %v635_v29 }
 0x4cd   :  { %v668_v36 = vmul.f32 1.442695, %v630_v32  ;;  %v2707_v37 = vpop.f32.mrb[16].mxu1 }
 0x4ce   :  { %3130 = vpow2.f32 %v670_v34  ;;  %v645_v38 = vadd.f32 %v2707_v37, %v3570_v33  ;;  %v639_v39 = vpop.f32.mrb[17].mxu1 }
 0x4cf   :  { %3132 = vpow2.f32 %v668_v36  ;;  %v640_v40 = vadd.f32 %v639_v39, %v3575_v35 }
 0x4d0   :  { %v674_v42 = vmul.f32 1.442695, %v645_v38  ;;  %v3622_v38 = vld [vmem:[%s3975_s3 + $0xc0] sm:$0xff] }
 0x4d1   :  { %v672_v45 = vmul.f32 1.442695, %v640_v40  ;;  %v2710_v47 = vpop.f32.mrb[18].mxu1 }
 0x4d2   :  { %3134 = vpow2.f32 %v674_v42  ;;  %v655_v49 = vadd.f32 %v2710_v47, %v3582_v41  ;;  %v649_v50 = vpop.f32.mrb[19].mxu1 }
 0x4d3   :  { %3136 = vpow2.f32 %v672_v45  ;;  %v650_v52 = vadd.f32 %v649_v50, %v3587_v44 }
 0x4d4   :  { %v678_v54 = vmul.f32 1.442695, %v655_v49 }
 0x4d5   :  { %v676_v2 = vmul.f32 1.442695, %v650_v52  ;;  %v2713_v3 = vpop.f32.mrb[20].mxu1 }
 0x4d6   :  { %3138 = vpow2.f32 %v678_v54  ;;  %v665_v4 = vadd.f32 %v2713_v3, %v3594_v53  ;;  %v659_v5 = vpop.f32.mrb[21].mxu1 }
 0x4d7   :  { %3140 = vpow2.f32 %v676_v2  ;;  %v660_v8 = vadd.f32 %v659_v5, %v3599_v57 }
 0x4d8   :  { %v3131_v10 = vpop.eup %3130  ;;  %v682_v11 = vmul.f32 1.442695, %v665_v4 }
 0x4d9   :  { %v3133_v12 = vpop.eup %3132  ;;  %v680_v15 = vmul.f32 1.442695, %v660_v8  ;;  %v687_v16 = vsel %vm391_vm3, %v3131_v10, 0.0 }
 0x4da   :  { %3142 = vpow2.f32 %v682_v11  ;;  %688 = vadd.xlane.f32.xlu1 %v687_v16  ;;  %2718 = vmatprep.mubr.msk.f32.mxu1 %vm391_vm3, %v3133_v12  ;;  %v684_v17 = vsel %vm391_vm3, %v3133_v12, 0.0 }
 0x4db   :  { %3144 = vpow2.f32 %v680_v15  ;;  %685 = vadd.xlane.f32.xlu0 %v684_v17  ;;  %2719 = vmatmul.mubr.msk.f32.vlgmr.msra.gmra.mrb[22].mxu1 %vm391_vm3, %v3131_v10 }
 0x4dc   :  { %v3135_v18 = vpop.eup %3134 }
 0x4dd   :  { %v3137_v21 = vpop.eup %3136  ;;  %v693_v22 = vsel %vm391_vm3, %v3135_v18, 0.0 }
 0x4de   :  { %694 = vadd.xlane.f32.xlu1 %v693_v22  ;;  %2721 = vmatprep.mubr.msk.f32.mxu1 %vm391_vm3, %v3137_v21  ;;  %v690_v23 = vsel %vm391_vm3, %v3137_v21, 0.0 }
 0x4df   :  { %691 = vadd.xlane.f32.xlu0 %v690_v23  ;;  %2722 = vmatmul.mubr.msk.f32.gmra.mrb[24].mxu1 %vm391_vm3, %v3135_v18 }
 0x4e0   :  { %v3139_v24 = vpop.eup %3138 }
 0x4e1   :  { %v3141_v28 = vpop.eup %3140  ;;  %v699_v29 = vsel %vm391_vm3, %v3139_v24, 0.0 }
 0x4e2   :  { %700 = vadd.xlane.f32.xlu1 %v699_v29  ;;  %2724 = vmatprep.mubr.msk.f32.mxu1 %vm391_vm3, %v3141_v28  ;;  %v696_v31 = vsel %vm391_vm3, %v3141_v28, 0.0 }
 0x4e3   :  { %697 = vadd.xlane.f32.xlu0 %v696_v31  ;;  %2725 = vmatmul.mubr.msk.f32.gmra.mrb[26].mxu1 %vm391_vm3, %v3139_v24 }
 0x4e4   :  { %v3143_v32 = vpop.eup %3142 }
 0x4e5   :  { %v3145_v34 = vpop.eup %3144  ;;  %v705_v36 = vsel %vm391_vm3, %v3143_v32, 0.0 }
 0x4e6   :  { %706 = vadd.xlane.f32.xlu1 %v705_v36  ;;  %2727 = vmatprep.mubr.msk.f32.mxu1 %vm391_vm3, %v3145_v34  ;;  %v702_v37 = vsel %vm391_vm3, %v3145_v34, 0.0 }
 0x4e7   :  { %2728 = vmatmul.mubr.msk.f32.gmra.mrb[28].mxu1 %vm391_vm3, %v3143_v32  ;;  %703 = vadd.xlane.f32.xlu0 %v702_v37 }
 0x4e8   :  { %2746 = vmatprep.mubr.msk.f32.mxu1 %vm76_vm0, %v3622_v38 }
 0x567   :  { %v689_v39 = vpop.xlane.xlu1 %688 }
 0x568   :  { %v686_v40 = vpop.xlane.xlu0 %685  ;;  %3146 = vrcp.f32 %v689_v39 }
 0x569   :  { %3148 = vrcp.f32 %v686_v40 }
 0x56b   :  { %v695_v42 = vpop.xlane.xlu1 %694 }
 0x56c   :  { %v692_v45 = vpop.xlane.xlu0 %691  ;;  %3150 = vrcp.f32 %v695_v42 }
 0x56d   :  { %3152 = vrcp.f32 %v692_v45 }
 0x56f   :  { %v701_v47 = vpop.xlane.xlu1 %700 }
 0x570   :  { %v698_v49 = vpop.xlane.xlu0 %697  ;;  %3154 = vrcp.f32 %v701_v47 }
 0x571   :  { %3156 = vrcp.f32 %v698_v49 }
 0x572   :  { %v3147_v52 = vpop.eup %3146 }
 0x573   :  { %v707_v50 = vpop.xlane.xlu1 %706  ;;  %v3149_v3 = vpop.eup %3148 }
 0x574   :  { %v704_v54 = vpop.xlane.xlu0 %703  ;;  %3158 = vrcp.f32 %v707_v50 }
 0x575   :  { %3160 = vrcp.f32 %v704_v54 }
 0x576   :  { %v3151_v11 = vpop.eup %3150 }
 0x577   :  { %v3153_v16 = vpop.eup %3152 }
 0x57a   :  { %v3155_v24 = vpop.eup %3154 }
 0x57b   :  { %v3157_v31 = vpop.eup %3156 }
 0x57e   :  { %v3159_v40 = vpop.eup %3158 }
 0x57f   :  { %v3161_v47 = vpop.eup %3160 }
 0x5ae   :  { %v2720_v2 = vpop.f32.mrb[22].mxu1 }
 0x5af   :  { %v849_v4 = vmul.f32 %v3147_v52, %v2720_v2  ;;  %v801_v5 = vpop.f32.mrb[23].mxu1 }
 0x5b0   :  { %v848_v8 = vmul.f32 %v3149_v3, %v801_v5  ;;  %v178_v3 = vld [vmem:[%s3978_s2] sm:$0xff] }
 0x5b1   :  { %v857_v10 = vmul.f32 %v849_v4, %v3505_v1  ;;  %v179_v4 = vld [vmem:[%s3978_s2 + $0x8] sm:$0xff] }
 0x5b2   :  { %v856_v12 = vmul.f32 %v848_v8, %v3500_v63  ;;  %v2723_v15 = vpop.f32.mrb[24].mxu1 }
 0x5b3   :  { %v851_v17 = vmul.f32 %v3151_v11, %v2723_v15  ;;  %v811_v18 = vpop.f32.mrb[25].mxu1  ;;  %v180_v11 = vld [vmem:[%s3978_s2 + $0x10] sm:$0xff]  ;;  %v3649_v15 = vld [vmem:[%s3975_s3 + $0xc8] sm:$0x3] }
 0x5b4   :  { %v850_v21 = vmul.f32 %v3153_v16, %v811_v18  ;;  %v2986_v22 = vpack.c.bf16 %v857_v10, %v856_v12  ;;  %v3002_v10 = vpack.c.bf16 %v179_v4, %v178_v3  ;;  %v181_v12 = vld [vmem:[%s3978_s2 + $0x18] sm:$0xff] }
 0x5b5   :  { %v859_v23 = vmul.f32 %v851_v17, %v3517_v7  ;;  %v3006_v16 = vpack.c.bf16 %v181_v12, %v180_v11  ;;  %v169_v3 = vld [vmem:[%s3977_s1 + $0x58] sm:$0xff] }
 0x5b6   :  { %v858_v28 = vmul.f32 %v850_v21, %v3512_v6  ;;  %v2726_v29 = vpop.f32.mrb[26].mxu1  ;;  %2987 = vmatprep.subr.bf16.mxu1 %v2986_v22  ;;  %v190_v21 = vld [vmem:[%s3978_s2 + $0x60] sm:$0xff]  ;;  %v173_v4 = vld [vmem:[%s3977_s1 + $0x78] sm:$0xff] }
 0x5b7   :  { %v853_v32 = vmul.f32 %v3155_v24, %v2726_v29  ;;  %v821_v34 = vpop.f32.mrb[27].mxu1  ;;  %2989 = vmatpush3.bf16.msra.mxu1 %v2986_v22  ;;  %v1031_v22 = vrot.slane %v190_v21, %v3414_v30 }
 0x5b8   :  { %v852_v36 = vmul.f32 %v3157_v31, %v821_v34  ;;  %v2990_v37 = vpack.c.bf16 %v859_v23, %v858_v28 }
 0x5b9   :  { %v861_v39 = vmul.f32 %v853_v32, %v3533_v14 }
 0x5ba   :  { %v860_v42 = vmul.f32 %v852_v36, %v3528_v13  ;;  %v2729_v45 = vpop.f32.mrb[28].mxu1  ;;  %2991 = vmatprep.subr.bf16.mxu1 %v2990_v37 }
 0x5bb   :  { %v855_v49 = vmul.f32 %v3159_v40, %v2729_v45  ;;  %v831_v50 = vpop.f32.mrb[29].mxu1  ;;  %2993 = vmatpush3.bf16.msra.mxu1 %v2990_v37 }
 0x5bc   :  { %v854_v52 = vmul.f32 %v3161_v47, %v831_v50  ;;  %v2994_v54 = vpack.c.bf16 %v861_v39, %v860_v42 }
 0x5bd   :  { %v863_v2 = vmul.f32 %v855_v49, %v3547_v20 }
 0x5be   :  { %v862_v5 = vmul.f32 %v854_v52, %v3542_v19  ;;  %2995 = vmatprep.subr.bf16.mxu1 %v2994_v54  ;;  %v161_v52 = vld [vmem:[%s3977_s1 + $0x18] sm:$0xff] }
 0x5bf   :  { %2997 = vmatpush3.bf16.msra.mxu1 %v2994_v54  ;;  %v165_v54 = vld [vmem:[%s3977_s1 + $0x38] sm:$0xff] }
 0x5c0   :  { %v2998_v8 = vpack.c.bf16 %v863_v2, %v862_v5  ;;  %v3010_v2 = vpack.c.bf16 %v165_v54, %v161_v52  ;;  %v3014_v5 = vpack.c.bf16 %v173_v4, %v169_v3 }
 0x5c2   :  { %2999 = vmatprep.subr.bf16.mxu1 %v2998_v8  ;;  %3011 = vmatprep.subr.bf16.mxu0 %v3010_v2 }
 0x5c3   :  { %3001 = vmatpush3.bf16.msra.mxu1 %v2998_v8  ;;  %3013 = vmatpush3.bf16.msra.mxu0 %v3010_v2 }
 0x5c4   :  { %3003 = vmatprep.subr.bf16.mxu1 %v3002_v10  ;;  %3015 = vmatprep.subr.bf16.mxu0 %v3014_v5 }
 0x5c6   :  { %2747 = vmatmul.mubr.msk.f32.vlgmr.msra.gmra.mrb[30].mxu1 %vm76_vm0, %v3649_v15 }
 0x5c7   :  { %3005 = vmatpush3.bf16.msra.mxu1 %v3002_v10  ;;  %3017 = vmatpush3.bf16.msra.mxu0 %v3014_v5 }
 0x5c8   :  { %3007 = vmatprep.subr.bf16.mxu1 %v3006_v16 }
 0x5cb   :  { %3009 = vmatpush3.bf16.msra.mxu1 %v3006_v16 }
 0x699   :  { %v2748_v17 = vpop.f32.mrb[30].mxu1 }
 0x69a   :  { %v936_v18 = vpop.f32.mrb[31].mxu1 }
 0x69b   :  { %2757 = vmatprep.mubr.msk.f32.mxu1 %vm192_vm1, %v936_v18 }
 0x69c   :  { %2758 = vmatmul.mubr.msk.f32.vlgmr.msra.gmra.mrb[32].mxu1 %vm192_vm1, %v2748_v17 }
 0x76f   :  { %v2759_v23 = vpop.f32.mrb[32].mxu1 }
 0x770   :  { %v1027_v24 = vadd.f32 %v2759_v23, %v3357_v48  ;;  %v1017_v28 = vpop.f32.mrb[33].mxu1 }
 0x771   :  { %v1026_v29 = vadd.f32 %v1017_v28, %v3350_v43  ;;  %v183_v28 = vld [vmem:[%s3978_s2 + $0x28] sm:$0xff] }
 0x772   :  { %v3661_v31 = vadd.f32 %v1031_v22, %v1027_v24  ;;  %v182_v24 = vld [vmem:[%s3978_s2 + $0x20] sm:$0xff] }
 0x773   :  { %v3663_v32 = vadd.f32 %v1031_v22, %v1026_v29  ;;  %v3018_v29 = vpack.c.bf16 %v183_v28, %v182_v24 }
 0x774   :  { %v1037_v34 = vsel %vm196_vm2, %v3661_v31, 0.0 }
 0x775   :  { %1038 = vadd.xlane.f32.xlu1 %v1037_v34  ;;  %v1034_v36 = vsel %vm192_vm1, %v3663_v32, 0.0  ;;  %3019 = vmatprep.subr.bf16.mxu1 %v3018_v29  ;;  %v184_v34 = vld [vmem:[%s3978_s2 + $0x30] sm:$0xff] }
 0x776   :  { %1035 = vadd.xlane.f32.xlu0 %v1034_v36  ;;  %3021 = vmatpush3.bf16.msra.mxu1 %v3018_v29  ;;  %v185_v36 = vld [vmem:[%s3978_s2 + $0x38] sm:$0xff] }
 0x802   :  { %v1039_v37 = vpop.xlane.xlu1 %1038 }
 0x803   :  { %v1041_v39 = vmul.f32 0.03125, %v1039_v37  ;;  %v1036_v40 = vpop.xlane.xlu0 %1035  ;;  %v3022_v37 = vpack.c.bf16 %v185_v36, %v184_v34 }
 0x804   :  { %v1040_v42 = vmul.f32 0.03125, %v1036_v40  ;;  %v187_v40 = vld [vmem:[%s3978_s2 + $0x48] sm:$0xff] }
 0x805   :  { %v1043_v48 = vsub.f32 %v3661_v31, %v1041_v39  ;;  %3023 = vmatprep.subr.bf16.mxu1 %v3022_v37  ;;  %v186_v39 = vld [vmem:[%s3978_s2 + $0x40] sm:$0xff] }
 0x806   :  { %v1042_v43 = vsub.f32 %v3663_v32, %v1040_v42  ;;  %3025 = vmatpush3.bf16.msra.mxu1 %v3022_v37  ;;  %v3026_v42 = vpack.c.bf16 %v187_v40, %v186_v39 }
 0x807   :  { %v1045_v45 = vmul.f32 %v1043_v48, %v1043_v48 }
 0x808   :  { %v1044_v47 = vmul.f32 %v1042_v43, %v1042_v43  ;;  %3027 = vmatprep.subr.bf16.mxu1 %v3026_v42 }
 0x809   :  { %v1049_v49 = vsel %vm196_vm2, %v1045_v45, 0.0 }
 0x80a   :  { %1050 = vadd.xlane.f32.xlu1 %v1049_v49  ;;  %v1046_v50 = vsel %vm192_vm1, %v1044_v47, 0.0  ;;  %3029 = vmatpush3.bf16.msra.mxu1 %v3026_v42  ;;  %v177_v47 = vld [vmem:[%s3977_s1 + $0x98] sm:$0xff] }
 0x80b   :  { %1047 = vadd.xlane.f32.xlu0 %v1046_v50  ;;  %v1063_v49 = vrot.slane %v177_v47, %v3414_v30 }
 0x897   :  { %v1051_v8 = vpop.xlane.xlu1 %1050 }
 0x898   :  { %v1053_v10 = vmul.f32 0.03125, %v1051_v8  ;;  %v1048_v11 = vpop.xlane.xlu0 %1047 }
 0x899   :  { %v1052_v12 = vmul.f32 0.03125, %v1048_v11 }
 0x89a   :  { %v1055_v16 = vadd.f32 1e-12, %v1053_v10 }
 0x89b   :  { %v1054_v17 = vadd.f32 1e-12, %v1052_v12 }
 0x89c   :  { %3162 = vrsqrt.f32 %v1055_v16 }
 0x89d   :  { %3164 = vrsqrt.f32 %v1054_v17 }
 0x8a6   :  { %v3163_v18 = vpop.eup %3162 }
 0x8a7   :  { %v3165_v21 = vpop.eup %3164  ;;  %v1059_v23 = vmul.f32 %v3163_v18, %v1043_v48  ;;  %v188_v48 = vld [vmem:[%s3978_s2 + $0x50] sm:$0xff] }
 0x8a8   :  { %v1058_v22 = vmul.f32 %v3165_v21, %v1042_v43  ;;  %v189_v43 = vld [vmem:[%s3978_s2 + $0x58] sm:$0xff]  ;;  %v191_v21 = vld [vmem:[%s3978_s2 + $0x68] sm:$0xff] }
 0x8a9   :  { %v3030_v45 = vpack.c.bf16 %v189_v43, %v188_v48 }
 0x8aa   :  { %2768 = vmatprep.mubr.msk.f32.mxu0 %vm192_vm1, %v1058_v22  ;;  %v1241_v22 = vrot.slane %v191_v21, %v3414_v30 }
 0x8ab   :  { %2769 = vmatmul.mubr.msk.f32.vlgmr.msra.gmra.mrb[4].mxu0 %vm192_vm1, %v1059_v23  ;;  %3031 = vmatprep.subr.bf16.mxu1 %v3030_v45 }
 0x8ac   :  { %1388 = vmatprep.mubr.f32.mxu0 %v3221_v9  ;;  %3033 = vmatpush3.bf16.msra.mxu1 %v3030_v45 }
 0x97e   :  { %v2770_v50 = vpop.f32.mrb[4].mxu0 }
 0x97f   :  { %v1142_v52 = vadd.f32 %v2770_v50, %v1063_v49  ;;  %v1136_v54 = vpop.f32.mrb[5].mxu0  ;;  %v2454_v50 = vld [vmem:[%s3977_s1 + $0xa8] sm:$0xff] }
 0x980   :  { %v1137_v2 = vadd.f32 %v1136_v54, %v1063_v49  ;;  %v2453_v54 = vld [vmem:[%s3977_s1 + $0xa0] sm:$0xff] }
 0x981   :  { %v1148_v3 = vmul.f32 0.70710677, %v1142_v52  ;;  %v1146_v16 = vmul.f32 0.5, %v1142_v52  ;;  %v2458_v52 = vld [vmem:[%s3977_s1 + $0xc8] sm:$0xff] }
 0x982   :  { %v1147_v4 = vmul.f32 0.70710677, %v1137_v2  ;;  %v1145_v11 = vmul.f32 0.5, %v1137_v2  ;;  %v3034_v2 = vpack.c.bf16 %v2458_v52, %v2454_v50 }
 0x983   :  { %3166 = verf.f32 %v1148_v3  ;;  %v2457_v3 = vld [vmem:[%s3977_s1 + $0xc0] sm:$0xff] }
 0x984   :  { %3168 = verf.f32 %v1147_v4  ;;  %v2462_v4 = vld [vmem:[%s3977_s1 + $0xe8] sm:$0xff]  ;;  %3035 = vmatprep.subr.bf16.mxu0 %v3034_v2 }
 0x98d   :  { %v3167_v5 = vpop.eup %3166 }
 0x98e   :  { %v3169_v8 = vpop.eup %3168  ;;  %v1152_v10 = vadd.f32 1.0, %v3167_v5  ;;  %v2466_v5 = vld [vmem:[%s3977_s1 + $0x108] sm:$0xff] }
 0x98f   :  { %v1151_v12 = vadd.f32 1.0, %v3169_v8  ;;  %v3036_v8 = vpack.c.bf16 %v2457_v3, %v2453_v54  ;;  %v2471_v54 = vld [vmem:[%s3977_s1 + $0x130] sm:$0xff] }
 0x990   :  { %v1154_v18 = vmul.f32 %v1152_v10, %v1146_v16  ;;  %v3038_v10 = vpack.c.bf16 %v2466_v5, %v2462_v4  ;;  %v1317_v5 = vrot.slane %v2471_v54, %v3414_v30 }
 0x991   :  { %v1153_v17 = vmul.f32 %v1151_v12, %v1145_v11  ;;  %v2461_v11 = vld [vmem:[%s3977_s1 + $0xe0] sm:$0xff]  ;;  %3037 = vmatpush1.bf16.msra.mxu0 %v3036_v8 }
 0x992   :  { %v2465_v12 = vld [vmem:[%s3977_s1 + $0x100] sm:$0xff]  ;;  %3039 = vmatprep.subr.bf16.mxu0 %v3038_v10 }
 0x993   :  { %2787 = vmatprep.mubr.msk.f32.mxu1 %vm76_vm0, %v1153_v17  ;;  %v3040_v16 = vpack.c.bf16 %v2465_v12, %v2461_v11  ;;  %v2455_v17 = vld [vmem:[%s3977_s1 + $0xb0] sm:$0xff] }
 0x994   :  { %2788 = vmatmul.mubr.msk.f32.vlgmr.msra.gmra.mrb[34].mxu1 %vm76_vm0, %v1154_v18  ;;  %v2459_v18 = vld [vmem:[%s3977_s1 + $0xd0] sm:$0xff] }
 0x995   :  { %2811 = vmatprep.mubr.msk.f32.mxu1 %vm391_vm3, %v3466_v59  ;;  %3041 = vmatpush1.bf16.msra.mxu0 %v3040_v16  ;;  %v3042_v21 = vpack.c.bf16 %v2459_v18, %v2455_v17 }
 0x997   :  { %3043 = vmatprep.subr.bf16.mxu0 %v3042_v21 }
 0xa67   :  { %v2789_v23 = vpop.f32.mrb[34].mxu1 }
 0xa68   :  { %v1237_v24 = vadd.f32 %v2789_v23, %v3661_v31  ;;  %v1227_v28 = vpop.f32.mrb[35].mxu1 }
 0xa69   :  { %v1236_v29 = vadd.f32 %v1227_v28, %v3663_v32 }
 0xa6a   :  { %v3726_v34 = vadd.f32 %v1241_v22, %v1237_v24 }
 0xa6b   :  { %v3728_v36 = vadd.f32 %v1241_v22, %v1236_v29 }
 0xa6c   :  { %v1283_v37 = vsel %vm196_vm2, %v3726_v34, 0.0 }
 0xa6d   :  { %1284 = vadd.xlane.f32.xlu1 %v1283_v37  ;;  %v1280_v59 = vsel %vm192_vm1, %v3728_v36, 0.0 }
 0xa6e   :  { %1281 = vadd.xlane.f32.xlu0 %v1280_v59  ;;  %v2463_v59 = vld [vmem:[%s3977_s1 + $0xf0] sm:$0xff] }
 0xafa   :  { %v1285_v39 = vpop.xlane.xlu1 %1284 }
 0xafb   :  { %v1287_v40 = vmul.f32 0.03125, %v1285_v39  ;;  %v1282_v42 = vpop.xlane.xlu0 %1281  ;;  %v2467_v39 = vld [vmem:[%s3977_s1 + $0x110] sm:$0xff] }
 0xafc   :  { %v1286_v48 = vmul.f32 0.03125, %v1282_v42 }
 0xafd   :  { %v1289_v31 = vsub.f32 %v3726_v34, %v1287_v40 }
 0xafe   :  { %v1288_v32 = vsub.f32 %v3728_v36, %v1286_v48  ;;  %v3046_v48 = vpack.c.bf16 %v2467_v39, %v2463_v59 }
 0xaff   :  { %v1291_v43 = vmul.f32 %v1289_v31, %v1289_v31 }
 0xb00   :  { %v1290_v45 = vmul.f32 %v1288_v32, %v1288_v32 }
 0xb01   :  { %v1295_v47 = vsel %vm196_vm2, %v1291_v43, 0.0 }
 0xb02   :  { %1296 = vadd.xlane.f32.xlu1 %v1295_v47  ;;  %v1292_v49 = vsel %vm192_vm1, %v1290_v45, 0.0  ;;  %v2470_v47 = vld [vmem:[%s3977_s1 + $0x128] sm:$0xff] }
 0xb03   :  { %1293 = vadd.xlane.f32.xlu0 %v1292_v49  ;;  %v1313_v52 = vrot.slane %v2470_v47, %v3414_v30 }
 0xb8f   :  { %v1297_v22 = vpop.xlane.xlu1 %1296 }
 0xb90   :  { %v1299_v23 = vmul.f32 0.03125, %v1297_v22  ;;  %v1294_v24 = vpop.xlane.xlu0 %1293 }
 0xb91   :  { %v1298_v28 = vmul.f32 0.03125, %v1294_v24 }
 0xb92   :  { %v1301_v29 = vadd.f32 1e-12, %v1299_v23 }
 0xb93   :  { %v1300_v37 = vadd.f32 1e-12, %v1298_v28 }
 0xb95   :  { %3170 = vrsqrt.f32 %v1300_v37 }
 0xb96   :  { %3172 = vrsqrt.f32 %v1301_v29 }
 0xb9f   :  { %v3171_v40 = vpop.eup %3170 }
 0xba0   :  { %v1304_v42 = vmul.f32 %v3171_v40, %v1288_v32  ;;  %v3173_v43 = vpop.eup %3172  ;;  %v2469_v32 = vld [vmem:[%s3977_s1 + $0x120] sm:$0xff] }
 0xba1   :  { %v1305_v45 = vmul.f32 %v3173_v43, %v1289_v31  ;;  %v1309_v49 = vrot.slane %v2469_v32, %v3414_v30 }
 0xba2   :  { %2487 = vmatmul.mubr.msk.f32.vlgmr.msra.gmra.mrb[6].mxu0 %vm192_vm1, %v1304_v42 }
 0xba3   :  { %3045 = vmatpush3.bf16.msra.mxu0 %v3042_v21  ;;  %1394 = vmatprep.mubr.f32.mxu0 %v3221_v9 }
 0xba4   :  { %3047 = vmatprep.subr.bf16.mxu0 %v3046_v48 }
 0xba6   :  { %2488 = vmatmul.mubr.msk.f32.gmra.mrb[8].mxu0 %vm192_vm1, %v1305_v45 }
 0xba7   :  { %3049 = vmatpush3.bf16.msra.mxu0 %v3046_v48  ;;  %2798 = vmatprep.mubr.msk.f32.mxu0 %vm192_vm1, %v1304_v42 }
 0xbaa   :  { %2799 = vmatmul.mubr.msk.f32.vlgmr.msra.gmra.mrb[10].mxu0 %vm192_vm1, %v1305_v45 }
 0xbab   :  { %2805 = vmatprep.mubr.msk.f32.mxu0 %vm391_vm3, %v3410_v27 }
 0xc75   :  { %v1390_v31 = vpop.f32.mrb[6].mxu0 }
 0xc76   :  { %v1392_v50 = vpop.f32.mrb[7].mxu0  ;;  %v1391_v27 = vadd.f32 %v1390_v31, %v1309_v49 }
 0xc77   :  { %v1393_v8 = vadd.f32 %v1392_v50, %v1313_v52 }
 0xc79   :  { %v1396_v2 = vpop.f32.mrb[8].mxu0 }
 0xc7a   :  { %v1397_v3 = vadd.f32 %v1396_v2, %v1309_v49  ;;  %v1398_v4 = vpop.f32.mrb[9].mxu0 }
 0xc7b   :  { %v1399_v10 = vadd.f32 %v1398_v4, %v1313_v52 }
 0xc7c   :  { %v3050_v11 = vpack.c.bf16 %v1397_v3, %v1391_v27 }
 0xc7d   :  { %v3056_v12 = vpack.c.bf16 %v1399_v10, %v1393_v8  ;;  %v2800_v16 = vpop.f32.mrb[10].mxu0 }
 0xc7e   :  { %v1473_v17 = vadd.f32 %v2800_v16, %v1317_v5  ;;  %v1467_v18 = vpop.f32.mrb[11].mxu0  ;;  %3052 = vmatprep.subr.msk.bf16.mxu0 %vm3428_vm6, %v3050_v11  ;;  %3120 = vmatprep.subr.msk.bf16.mxu1 %vm3428_vm6, %v3050_v11 }
 0xc7f   :  { %v1468_v21 = vadd.f32 %v1467_v18, %v1317_v5  ;;  %3055 = vmatpush3.bf16.msk.msra.mxu0 %vm3428_vm6, %v3050_v11  ;;  %3121 = vmatpush3.bf16.msk.msra.mxu1 %vm3428_vm6, %v3050_v11 }
 0xc80   :  { %3058 = vmatprep.subr.msk.bf16.mxu0 %vm3434_vm7, %v3056_v12 }
 0xc81   :  { %v3062_v22 = vpack.c.bf16 %v1473_v17, %v1468_v21 }
 0xc82   :  { %2806 = vmatmul.mubr.msk.f32.vlgmr.msra.gmra.mrb[12].mxu0 %vm391_vm3, %v3445_v55  ;;  %2812 = vmatmul.mubr.msk.f32.vlgmr.msra.gmra.mrb[36].mxu1 %vm391_vm3, %v3475_v60 }
 0xc83   :  { %3064 = vmatprep.subr.msk.bf16.mxu1 %vm3428_vm6, %v3062_v22  ;;  %2808 = vmatprep.mubr.msk.f32.mxu0 %vm391_vm3, %v3452_v56 }
 0xc84   :  { %3067 = vmatpush3.bf16.msk.msra.mxu1 %vm3428_vm6, %v3062_v22  ;;  %2814 = vmatprep.mubr.msk.f32.mxu1 %vm391_vm3, %v3482_v61 }
 0xc86   :  { %2809 = vmatmul.mubr.msk.f32.gmra.mrb[14].mxu0 %vm391_vm3, %v3461_v58  ;;  %2815 = vmatmul.mubr.msk.f32.gmra.mrb[38].mxu1 %vm391_vm3, %v3493_v62 }
 0xc88   :  { %3061 = vmatpush3.bf16.xpose.msk.msra.mxu0 %vm3434_vm7, %v3056_v12 }
 0xd55   :  { %v2807_v55 = vpop.f32.mrb[12].mxu0  ;;  %v2813_v60 = vpop.f32.mrb[36].mxu1 }
 0xd56   :  { %v1545_v23 = vpop.f32.mrb[13].mxu0  ;;  %v1565_v24 = vpop.f32.mrb[37].mxu1  ;;  %v1585_v28 = vmul.f32 %v2807_v55, %v3505_v1  ;;  %v1589_v40 = vmul.f32 %v2813_v60, %v3533_v14 }
 0xd57   :  { %v1584_v56 = vmul.f32 %v1545_v23, %v3500_v63  ;;  %v1588_v51 = vmul.f32 %v1565_v24, %v3528_v13 }
 0xd59   :  { %v2810_v29 = vpop.f32.mrb[14].mxu0  ;;  %2821 = vmatprep.mubr.msk.f32.mxu0 %vm192_vm1, %v1584_v56  ;;  %v2816_v61 = vpop.f32.mrb[38].mxu1 }
 0xd5a   :  { %v1555_v37 = vpop.f32.mrb[15].mxu0  ;;  %2822 = vmatmul.mubr.msk.f32.vlgmr.msra.gmra.mrb[16].mxu0 %vm192_vm1, %v1585_v28  ;;  %v1575_v58 = vpop.f32.mrb[39].mxu1  ;;  %v1587_v59 = vmul.f32 %v2810_v29, %v3517_v7  ;;  %v1591_v42 = vmul.f32 %v2816_v61, %v3547_v20 }
 0xd5b   :  { %v1586_v62 = vmul.f32 %v1555_v37, %v3512_v6  ;;  %v1590_v39 = vmul.f32 %v1575_v58, %v3542_v19 }
 0xd5d   :  { %2824 = vmatprep.mubr.msk.f32.mxu0 %vm192_vm1, %v1586_v62 }
 0xd5e   :  { %2825 = vmatmul.mubr.msk.f32.gmra.mrb[18].mxu0 %vm192_vm1, %v1587_v59 }
 0xd5f   :  { %2827 = vmatprep.mubr.msk.f32.mxu0 %vm192_vm1, %v1588_v51 }
 0xd62   :  { %2828 = vmatmul.mubr.msk.f32.gmra.mrb[20].mxu0 %vm192_vm1, %v1589_v40 }
 0xd63   :  { %2830 = vmatprep.mubr.msk.f32.mxu0 %vm192_vm1, %v1590_v39 }
 0xd66   :  { %2831 = vmatmul.mubr.msk.f32.gmra.mrb[22].mxu0 %vm192_vm1, %v1591_v42 }
 0xd67   :  { %2865 = vmatprep.mubr.msk.f32.mxu0 %vm76_vm0, %v3622_v38 }
 0xe2d   :  { %v2823_v48 = vpop.f32.mrb[16].mxu0 }
 0xe2e   :  { %v1694_v43 = vadd.f32 %v2823_v48, %v3558_v25  ;;  %v1688_v45 = vpop.f32.mrb[17].mxu0 }
 0xe2f   :  { %v1689_v32 = vadd.f32 %v1688_v45, %v3563_v26 }
 0xe30   :  { %v1729_v47 = vmul.f32 1.442695, %v1694_v43 }
 0xe31   :  { %v1727_v31 = vmul.f32 1.442695, %v1689_v32  ;;  %v2826_v49 = vpop.f32.mrb[18].mxu0 }
 0xe32   :  { %3174 = vpow2.f32 %v1729_v47  ;;  %v1704_v50 = vadd.f32 %v2826_v49, %v3570_v33  ;;  %v1698_v52 = vpop.f32.mrb[19].mxu0 }
 0xe33   :  { %3176 = vpow2.f32 %v1727_v31  ;;  %v1699_v54 = vadd.f32 %v1698_v52, %v3575_v35 }
 0xe34   :  { %v1733_v2 = vmul.f32 1.442695, %v1704_v50 }
 0xe35   :  { %v1731_v27 = vmul.f32 1.442695, %v1699_v54  ;;  %v2829_v3 = vpop.f32.mrb[20].mxu0 }
 0xe36   :  { %3178 = vpow2.f32 %v1733_v2  ;;  %v1714_v38 = vadd.f32 %v2829_v3, %v3582_v41  ;;  %v1708_v25 = vpop.f32.mrb[21].mxu0 }
 0xe37   :  { %3180 = vpow2.f32 %v1731_v27  ;;  %v1709_v26 = vadd.f32 %v1708_v25, %v3587_v44 }
 0xe38   :  { %v1737_v4 = vmul.f32 1.442695, %v1714_v38 }
 0xe39   :  { %v1735_v5 = vmul.f32 1.442695, %v1709_v26  ;;  %v2832_v8 = vpop.f32.mrb[22].mxu0 }
 0xe3a   :  { %3182 = vpow2.f32 %v1737_v4  ;;  %v1724_v33 = vadd.f32 %v2832_v8, %v3594_v53  ;;  %v1718_v10 = vpop.f32.mrb[23].mxu0 }
 0xe3b   :  { %3184 = vpow2.f32 %v1735_v5  ;;  %v1719_v35 = vadd.f32 %v1718_v10, %v3599_v57 }
 0xe3c   :  { %v3175_v11 = vpop.eup %3174  ;;  %v1741_v12 = vmul.f32 1.442695, %v1724_v33 }
 0xe3d   :  { %v3177_v16 = vpop.eup %3176  ;;  %v1739_v17 = vmul.f32 1.442695, %v1719_v35  ;;  %v1746_v41 = vsel %vm391_vm3, %v3175_v11, 0.0 }
 0xe3e   :  { %3186 = vpow2.f32 %v1741_v12  ;;  %1747 = vadd.xlane.f32.xlu1 %v1746_v41  ;;  %2837 = vmatprep.mubr.msk.f32.mxu1 %vm391_vm3, %v3177_v16  ;;  %v1743_v44 = vsel %vm391_vm3, %v3177_v16, 0.0 }
 0xe3f   :  { %3188 = vpow2.f32 %v1739_v17  ;;  %2838 = vmatmul.mubr.msk.f32.vlgmr.msra.gmra.mrb[40].mxu1 %vm391_vm3, %v3175_v11  ;;  %1744 = vadd.xlane.f32.xlu0 %v1743_v44 }
 0xe40   :  { %v3179_v53 = vpop.eup %3178 }
 0xe41   :  { %v3181_v18 = vpop.eup %3180  ;;  %v1752_v57 = vsel %vm391_vm3, %v3179_v53, 0.0 }
 0xe42   :  { %1753 = vadd.xlane.f32.xlu1 %v1752_v57  ;;  %2840 = vmatprep.mubr.msk.f32.mxu1 %vm391_vm3, %v3181_v18  ;;  %v1749_v21 = vsel %vm391_vm3, %v3181_v18, 0.0  ;;  %v2473_v18 = vld [vmem:[%s3978_s2 + $0x70] sm:$0xff] }
 0xe43   :  { %2841 = vmatmul.mubr.msk.f32.gmra.mrb[42].mxu1 %vm391_vm3, %v3179_v53  ;;  %1750 = vadd.xlane.f32.xlu0 %v1749_v21 }
 0xe44   :  { %v3183_v22 = vpop.eup %3182 }
 0xe45   :  { %v3185_v55 = vpop.eup %3184  ;;  %v1758_v60 = vsel %vm391_vm3, %v3183_v22, 0.0 }
 0xe46   :  { %1759 = vadd.xlane.f32.xlu1 %v1758_v60  ;;  %2843 = vmatprep.mubr.msk.f32.mxu1 %vm391_vm3, %v3185_v55  ;;  %v1755_v23 = vsel %vm391_vm3, %v3185_v55, 0.0 }
 0xe47   :  { %2844 = vmatmul.mubr.msk.f32.gmra.mrb[44].mxu1 %vm391_vm3, %v3183_v22  ;;  %1756 = vadd.xlane.f32.xlu0 %v1755_v23  ;;  %v2475_v22 = vld [vmem:[%s3978_s2 + $0x80] sm:$0xff]  ;;  %v2485_v23 = vld [vmem:[%s3978_s2 + $0xd0] sm:$0xff] }
 0xe48   :  { %v3187_v24 = vpop.eup %3186 }
 0xe49   :  { %v3189_v56 = vpop.eup %3188  ;;  %v1764_v28 = vsel %vm391_vm3, %v3187_v24, 0.0 }
 0xe4a   :  { %1765 = vadd.xlane.f32.xlu1 %v1764_v28  ;;  %2846 = vmatprep.mubr.msk.f32.mxu1 %vm391_vm3, %v3189_v56  ;;  %v1761_v29 = vsel %vm391_vm3, %v3189_v56, 0.0 }
 0xe4b   :  { %2847 = vmatmul.mubr.msk.f32.gmra.mrb[46].mxu1 %vm391_vm3, %v3187_v24  ;;  %1762 = vadd.xlane.f32.xlu0 %v1761_v29  ;;  %v2084_v24 = vrot.slane %v2485_v23, %v3414_v30 }
 0xecb   :  { %v1748_v61 = vpop.xlane.xlu1 %1747 }
 0xecc   :  { %v1745_v37 = vpop.xlane.xlu0 %1744  ;;  %3190 = vrcp.f32 %v1748_v61 }
 0xecd   :  { %3192 = vrcp.f32 %v1745_v37 }
 0xecf   :  { %v1754_v58 = vpop.xlane.xlu1 %1753 }
 0xed0   :  { %v1751_v62 = vpop.xlane.xlu0 %1750  ;;  %3194 = vrcp.f32 %v1754_v58 }
 0xed1   :  { %3196 = vrcp.f32 %v1751_v62 }
 0xed3   :  { %v1760_v51 = vpop.xlane.xlu1 %1759 }
 0xed4   :  { %v1757_v59 = vpop.xlane.xlu0 %1756  ;;  %3198 = vrcp.f32 %v1760_v51 }
 0xed5   :  { %3200 = vrcp.f32 %v1757_v59 }
 0xed6   :  { %v3191_v40 = vpop.eup %3190 }
 0xed7   :  { %v1766_v39 = vpop.xlane.xlu1 %1765  ;;  %v3193_v43 = vpop.eup %3192 }
 0xed8   :  { %v1763_v42 = vpop.xlane.xlu0 %1762  ;;  %3202 = vrcp.f32 %v1766_v39 }
 0xed9   :  { %3204 = vrcp.f32 %v1763_v42 }
 0xeda   :  { %v3195_v49 = vpop.eup %3194 }
 0xedb   :  { %v3197_v54 = vpop.eup %3196 }
 0xede   :  { %v3199_v26 = vpop.eup %3198 }
 0xedf   :  { %v3201_v8 = vpop.eup %3200 }
 0xee2   :  { %v3203_v11 = vpop.eup %3202 }
 0xee3   :  { %v3205_v17 = vpop.eup %3204 }
 0xf12   :  { %v2839_v48 = vpop.f32.mrb[40].mxu1 }
 0xf13   :  { %v1908_v45 = vmul.f32 %v3191_v40, %v2839_v48  ;;  %v1860_v32 = vpop.f32.mrb[41].mxu1 }
 0xf14   :  { %v1907_v47 = vmul.f32 %v3193_v43, %v1860_v32  ;;  %v2456_v32 = vld [vmem:[%s3977_s1 + $0xb8] sm:$0xff] }
 0xf15   :  { %v1916_v31 = vmul.f32 %v1908_v45, %v3505_v1 }
 0xf16   :  { %v1915_v50 = vmul.f32 %v1907_v47, %v3500_v63  ;;  %v2842_v52 = vpop.f32.mrb[42].mxu1  ;;  %v2460_v47 = vld [vmem:[%s3977_s1 + $0xd8] sm:$0xff] }
 0xf17   :  { %v1910_v2 = vmul.f32 %v3195_v49, %v2842_v52  ;;  %v1870_v27 = vpop.f32.mrb[43].mxu1  ;;  %v2464_v49 = vld [vmem:[%s3977_s1 + $0xf8] sm:$0xff] }
 0xf18   :  { %v1909_v3 = vmul.f32 %v3197_v54, %v1870_v27  ;;  %v3068_v38 = vpack.c.bf16 %v1916_v31, %v1915_v50  ;;  %v3092_v31 = vpack.c.bf16 %v2460_v47, %v2456_v32  ;;  %v2468_v50 = vld [vmem:[%s3977_s1 + $0x118] sm:$0xff] }
 0xf19   :  { %v1918_v25 = vmul.f32 %v1910_v2, %v3517_v7  ;;  %v3096_v52 = vpack.c.bf16 %v2468_v50, %v2464_v49 }
 0xf1a   :  { %v1917_v4 = vmul.f32 %v1909_v3, %v3512_v6  ;;  %v2845_v5 = vpop.f32.mrb[44].mxu1  ;;  %3069 = vmatprep.subr.bf16.mxu0 %v3068_v38  ;;  %3093 = vmatprep.subr.bf16.mxu1 %v3092_v31 }
 0xf1b   :  { %v1912_v33 = vmul.f32 %v3199_v26, %v2845_v5  ;;  %v1880_v10 = vpop.f32.mrb[45].mxu1  ;;  %3071 = vmatpush3.bf16.msra.mxu0 %v3068_v38  ;;  %3095 = vmatpush3.bf16.msra.mxu1 %v3092_v31  ;;  %v2529_v31 = vld [vmem:[%s3975_s3 + $0x1a8] ss:$0 sm:$0xff] }
 0xf1c   :  { %v1911_v1 = vmul.f32 %v3201_v8, %v1880_v10  ;;  %v3072_v35 = vpack.c.bf16 %v1918_v25, %v1917_v4  ;;  %3097 = vmatprep.subr.bf16.mxu1 %v3096_v52 }
 0xf1d   :  { %v1920_v63 = vmul.f32 %v1912_v33, %v3533_v14  ;;  %v2474_v14 = vld [vmem:[%s3978_s2 + $0x78] sm:$0xff] }
 0xf1e   :  { %v1919_v12 = vmul.f32 %v1911_v1, %v3528_v13  ;;  %v2848_v16 = vpop.f32.mrb[46].mxu1  ;;  %3073 = vmatprep.subr.bf16.mxu0 %v3072_v35  ;;  %v3084_v21 = vpack.c.bf16 %v2474_v14, %v2473_v18  ;;  %v2478_v33 = vld [vmem:[%s3978_s2 + $0x98] sm:$0xff]  ;;  %v2479_v1 = vld [vmem:[%s3978_s2 + $0xa0] sm:$0xff] }
 0xf1f   :  { %v1914_v7 = vmul.f32 %v3203_v11, %v2848_v16  ;;  %v1890_v41 = vpop.f32.mrb[47].mxu1  ;;  %3075 = vmatpush3.bf16.msra.mxu0 %v3072_v35  ;;  %3099 = vmatpush3.bf16.msra.mxu1 %v3096_v52  ;;  %v2480_v35 = vld [vmem:[%s3978_s2 + $0xa8] sm:$0xff]  ;;  %v2481_v11 = vld [vmem:[%s3978_s2 + $0xb0] sm:$0xff] }
 0xf20   :  { %v1913_v6 = vmul.f32 %v3205_v17, %v1890_v41  ;;  %v3076_v44 = vpack.c.bf16 %v1920_v63, %v1919_v12  ;;  %3116 = vmatprep.subr.bf16.mxu1 %v3220_v0  ;;  %v2477_v0 = vld [vmem:[%s3978_s2 + $0x90] sm:$0xff]  ;;  %v3104_v63 = vpack.c.bf16 %v2480_v35, %v2479_v1  ;;  %v2482_v12 = vld [vmem:[%s3978_s2 + $0xb8] sm:$0xff]  ;;  %v2483_v17 = vld [vmem:[%s3978_s2 + $0xc0] sm:$0xff] }
 0xf21   :  { %v1922_v53 = vmul.f32 %v1914_v7, %v3547_v20  ;;  %v2476_v20 = vld [vmem:[%s3978_s2 + $0x88] sm:$0xff]  ;;  %v3100_v10 = vpack.c.bf16 %v2478_v33, %v2477_v0  ;;  %v3108_v16 = vpack.c.bf16 %v2482_v12, %v2481_v11 }
 0xf22   :  { %v1921_v13 = vmul.f32 %v1913_v6, %v3542_v19  ;;  %3077 = vmatprep.subr.bf16.mxu0 %v3076_v44  ;;  %v3088_v55 = vpack.c.bf16 %v2476_v20, %v2475_v22  ;;  %v2484_v7 = vld [vmem:[%s3978_s2 + $0xc8] sm:$0xff]  ;;  %v2472_v6 = vld [vmem:[%s3977_s1 + $0x138] sm:$0xff] }
 0xf23   :  { %3079 = vmatpush3.bf16.msra.mxu0 %v3076_v44  ;;  %v3112_v41 = vpack.c.bf16 %v2484_v7, %v2483_v17  ;;  %v2116_v44 = vrot.slane %v2472_v6, %v3414_v30 }
 0xf24   :  { %v3080_v57 = vpack.c.bf16 %v1922_v53, %v1921_v13 }
 0xf26   :  { %3081 = vmatprep.subr.bf16.mxu0 %v3080_v57 }
 0xf27   :  { %3083 = vmatpush3.bf16.msra.mxu0 %v3080_v57 }
 0xf28   :  { %3085 = vmatprep.subr.bf16.mxu0 %v3084_v21 }
 0xf2a   :  { %2866 = vmatmul.mubr.msk.f32.vlgmr.msra.gmra.mrb[24].mxu0 %vm76_vm0, %v3649_v15 }
 0xf2b   :  { %3087 = vmatpush3.bf16.msra.mxu0 %v3084_v21 }
 0xf2c   :  { %3089 = vmatprep.subr.bf16.mxu0 %v3088_v55 }
 0xf2f   :  { %3091 = vmatpush3.bf16.msra.mxu0 %v3088_v55 }
 0xf30   :  { %3101 = vmatprep.subr.bf16.mxu0 %v3100_v10 }
 0xffd   :  { %v2867_v19 = vpop.f32.mrb[24].mxu0 }
 0xffe   :  { %v1989_v60 = vpop.f32.mrb[25].mxu0 }
 0xfff   :  { %2876 = vmatprep.mubr.msk.f32.mxu0 %vm192_vm1, %v1989_v60 }
0x1000   :  { %2877 = vmatmul.mubr.msk.f32.vlgmr.msra.gmra.mrb[26].mxu0 %vm192_vm1, %v2867_v19 }
0x1001   :  { %3103 = vmatpush3.bf16.msra.mxu0 %v3100_v10 }
0x1002   :  { %3105 = vmatprep.subr.bf16.mxu0 %v3104_v63 }
0x1005   :  { %3107 = vmatpush3.bf16.msra.mxu0 %v3104_v63 }
0x1006   :  { %3109 = vmatprep.subr.bf16.mxu0 %v3108_v16 }
0x1009   :  { %3111 = vmatpush3.bf16.msra.mxu0 %v3108_v16 }
0x100a   :  { %3113 = vmatprep.subr.bf16.mxu0 %v3112_v41 }
0x100d   :  { %3115 = vmatpush3.bf16.msra.mxu0 %v3112_v41 }
0x10d3   :  { %v2878_v56 = vpop.f32.mrb[26].mxu0 }
0x10d4   :  { %v2080_v28 = vadd.f32 %v2878_v56, %v3726_v34  ;;  %v2070_v29 = vpop.f32.mrb[27].mxu0 }
0x10d5   :  { %v2079_v15 = vadd.f32 %v2070_v29, %v3728_v36 }
0x10d6   :  { %v3893_v61 = vadd.f32 %v2084_v24, %v2080_v28  ;;  %v2486_v28 = vld [vmem:[%s3978_s2 + $0xd8] sm:$0xff] }
0x10d7   :  { %v3895_v37 = vadd.f32 %v2084_v24, %v2079_v15  ;;  %v2294_v29 = vrot.slane %v2486_v28, %v3414_v30 }
0x10d8   :  { %v2090_v58 = vsel %vm196_vm2, %v3893_v61, 0.0 }
0x10d9   :  { %2091 = vadd.xlane.f32.xlu1 %v2090_v58  ;;  %v2087_v62 = vsel %vm192_vm1, %v3895_v37, 0.0 }
0x10da   :  { %2088 = vadd.xlane.f32.xlu0 %v2087_v62 }
0x1166   :  { %v2092_v51 = vpop.xlane.xlu1 %2091 }
0x1167   :  { %v2094_v59 = vmul.f32 0.03125, %v2092_v51  ;;  %v2089_v39 = vpop.xlane.xlu0 %2088 }
0x1168   :  { %v2093_v40 = vmul.f32 0.03125, %v2089_v39 }
0x1169   :  { %v2096_v34 = vsub.f32 %v3893_v61, %v2094_v59 }
0x116a   :  { %v2095_v36 = vsub.f32 %v3895_v37, %v2093_v40 }
0x116b   :  { %v2098_v42 = vmul.f32 %v2096_v34, %v2096_v34 }
0x116c   :  { %v2097_v48 = vmul.f32 %v2095_v36, %v2095_v36 }
0x116d   :  { %v2102_v43 = vsel %vm196_vm2, %v2098_v42, 0.0 }
0x116e   :  { %2103 = vadd.xlane.f32.xlu1 %v2102_v43  ;;  %v2099_v45 = vsel %vm192_vm1, %v2097_v48, 0.0 }
0x116f   :  { %2100 = vadd.xlane.f32.xlu0 %v2099_v45 }
0x11fb   :  { %v2104_v54 = vpop.xlane.xlu1 %2103 }
0x11fc   :  { %v2106_v2 = vmul.f32 0.03125, %v2104_v54  ;;  %v2101_v27 = vpop.xlane.xlu0 %2100  ;;  %v2530_v54 = vld [vmem:[%s3975_s3 + $0x1b0] ss:$0 sm:$0xff] }
0x11fd   :  { %v2105_v3 = vmul.f32 0.03125, %v2101_v27 }
0x11fe   :  { %v2108_v38 = vadd.f32 1e-12, %v2106_v2 }
0x11ff   :  { %v2107_v25 = vadd.f32 1e-12, %v2105_v3 }
0x1200   :  { %3206 = vrsqrt.f32 %v2108_v38 }
0x1201   :  { %3208 = vrsqrt.f32 %v2107_v25 }
0x120a   :  { %v3207_v26 = vpop.eup %3206 }
0x120b   :  { %v3209_v4 = vpop.eup %3208  ;;  %v2112_v8 = vmul.f32 %v3207_v26, %v2096_v34 }
0x120c   :  { %v2111_v5 = vmul.f32 %v3209_v4, %v2095_v36 }
0x120e   :  { %2887 = vmatprep.mubr.msk.f32.mxu1 %vm192_vm1, %v2111_v5 }
0x120f   :  { %2888 = vmatmul.mubr.msk.f32.vlgmr.msra.gmra.mrb[48].mxu1 %vm192_vm1, %v2112_v8 }
0x1210   :  { %2913 = vmatprep.mubr.msk.f32.mxu1 %vm3223_vm8, %v3221_v9  ;;  %v43_v9 = vld [vmem:[%s3975_s3 + $0xd0] sm:$0x3] }
0x12e2   :  { %v2889_v53 = vpop.f32.mrb[48].mxu1 }
0x12e3   :  { %v2195_v18 = vadd.f32 %v2889_v53, %v2116_v44  ;;  %v2189_v14 = vpop.f32.mrb[49].mxu1 }
0x12e4   :  { %v2190_v13 = vadd.f32 %v2189_v14, %v2116_v44 }
0x12e5   :  { %v2201_v57 = vmul.f32 0.70710677, %v2195_v18  ;;  %v2199_v23 = vmul.f32 0.5, %v2195_v18 }
0x12e6   :  { %v2200_v21 = vmul.f32 0.70710677, %v2190_v13  ;;  %v2198_v19 = vmul.f32 0.5, %v2190_v13 }
0x12e7   :  { %3210 = verf.f32 %v2201_v57 }
0x12e8   :  { %3212 = verf.f32 %v2200_v21 }
0x12f1   :  { %v3211_v22 = vpop.eup %3210 }
0x12f2   :  { %v3213_v20 = vpop.eup %3212  ;;  %v2205_v55 = vadd.f32 1.0, %v3211_v22 }
0x12f3   :  { %v2204_v60 = vadd.f32 1.0, %v3213_v20 }
0x12f4   :  { %v2207_v56 = vmul.f32 %v2205_v55, %v2199_v23 }
0x12f5   :  { %v2206_v24 = vmul.f32 %v2204_v60, %v2198_v19 }
0x12f7   :  { %2906 = vmatprep.mubr.msk.f32.mxu0 %vm76_vm0, %v2206_v24 }
0x12f8   :  { %2907 = vmatmul.mubr.msk.f32.vlgmr.msra.gmra.mrb[28].mxu0 %vm76_vm0, %v2207_v56 }
0x13cb   :  { %v2908_v15 = vpop.f32.mrb[28].mxu0 }
0x13cc   :  { %v2290_v58 = vadd.f32 %v2908_v15, %v3893_v61  ;;  %v2280_v62 = vpop.f32.mrb[29].mxu0 }
0x13cd   :  { %v2289_v51 = vadd.f32 %v2280_v62, %v3895_v37 }
0x13ce   :  { %v2296_v59 = vadd.f32 %v2294_v29, %v2290_v58 }
0x13cf   :  { %v2295_v39 = vadd.f32 %v2294_v29, %v2289_v51 }
0x13d1   :  { %v3117_v40 = vpack.c.bf16 %v2296_v59, %v2295_v39 }
0x13d3   :  { %3119 = vmatpush3.bf16.msk.msra.mxu1 %vm3428_vm6, %v3117_v40 }
0x13d6   :  { %2914 = vmatmul.mubr.msk.f32.vlgmr.msra.gmra.mrb[50].mxu1 %vm391_vm3, %v43_v9 }
0x14a9   :  { %v2369_v34 = vpop.f32.mrb[50].mxu1 }
0x14aa   :  { %v2915_v30 = vpop.f32.mrb[51].mxu1  ;;  %v2373_v36 = vsel %vm196_vm2, %v2369_v34, 0.0 }
0x14ab   :  { %2374 = vadd.xlane.f32.xlu0 %v2373_v36 }
0x1538   :  { %v2375_v61 = vpop.xlane.xlu0 %2374 }
0x1539   :  { %v2376_v42 = vmul.f32 0.03125, %v2375_v61 }
0x153b   :  { %v2377_v37 = vsub.f32 %v2369_v34, %v2376_v42 }
0x153d   :  { %v2378_v48 = vmul.f32 %v2377_v37, %v2377_v37 }
0x153f   :  { %v2379_v43 = vsel %vm196_vm2, %v2378_v48, 0.0 }
0x1540   :  { %2380 = vadd.xlane.f32.xlu1 %v2379_v43 }
0x15cd   :  { %v2381_v46 = vpop.xlane.xlu1 %2380 }
0x15ce   :  { %v2382_v45 = vmul.f32 0.03125, %v2381_v46 }
0x15d0   :  { %v2383_v32 = vadd.f32 1e-12, %v2382_v45 }
0x15d2   :  { %3214 = vrsqrt.f32 %v2383_v32 }
0x15dc   :  { %v3215_v47 = vpop.eup %3214 }
0x15dd   :  { %v2385_v49 = vmul.f32 %v3215_v47, %v2377_v37 }
0x15df   :  { %v2390_v50 = vmul.f32 %v2529_v31, %v2385_v49 }
0x15e1   :  { %v2391_v52 = vsel %vm196_vm2, %v2390_v50, 0.0 }
0x15e2   :  { %2392 = vadd.xlane.f32.xlu0 %v2391_v52 }
0x166f   :  { %v2393_v2 = vpop.xlane.xlu0 %2392 }
0x1670   :  { %v2398_v27 = vadd.f32 %v2530_v54, %v2393_v2 }
0x1672   :  { %v2531_v3 = vmul.f32 -1.442695, %v2398_v27 }
0x1674   :  { %3216 = vpow2.f32 %v2531_v3 }
0x167e   :  { %v3217_v38 = vpop.eup %3216 }
0x167f   :  { %v2402_v25 = vadd.f32 1.0, %v3217_v38 }
0x1681   :  { %3218 = vrcp.f32 %v2402_v25 }
0x168b   :  { %v3219_v26 = vpop.eup %3218 }
0x168c   :  { %2406 = vst.msk [vmem:[%s3979_s4] sm:$0x3] %vm2405_vm9, %v3219_v26 }

</bundles_post_ra>
